<compile_context>
chip_gen: v7x
topology: tpu7x:2x2x1
jax: 0.10.0
libtpu: 0.0.40
codegen_flags: <defaults>
</compile_context>

<pallas_src>
import functools

import jax
import jax.numpy as jnp
import numpy as np
from jax.experimental import pallas as pl
from jax.experimental.pallas import tpu as pltpu

BN_EPS = 1e-5


# ----------------------------------------------------------------------------
# Per-generation VMEM budget / L-tile selection
# ----------------------------------------------------------------------------
@functools.lru_cache(maxsize=None)
def _vmem_limit_bytes():
    cap = 64 * 1024 * 1024  # conservative fallback (v7x-sized)
    try:
        info = pltpu.get_tpu_info()
        c = getattr(info, "vmem_capacity_bytes", None)
        if c:
            cap = int(c)
    except Exception:
        pass
    # ~48 MiB on 64-MiB v7x, ~96 MiB on 128-MiB v5e/v6e parts.
    return max(32 * 1024 * 1024, min((cap * 3) // 4, cap - 8 * 1024 * 1024))


def _choose_l_tile(L, cin, cout, ksize, in_bytes, out_bytes, budget):
    """Largest multiple-of-128 divisor of L (<=4096) whose per-step VMEM fits."""
    if L % 128 != 0 or L <= 128:
        return L  # single tile (small / ragged L)

    def need(tl):
        x_in = cin * tl * in_bytes
        halos = 2 * cin * 128 * in_bytes
        w = ksize * cout * cin * 4
        small = (cout + 2 * cin) * 4
        y_out = cout * tl * out_bytes + cout * 2 * 4
        scratch = cin * (tl + 256) * 4
        return 2 * (x_in + halos + w + small) + 2 * y_out + scratch  # dbl-buffered

    best = 128
    tl = 128
    max_tl = min(L, 4096)
    while tl <= max_tl:
        if L % tl == 0 and need(tl) <= budget:
            best = tl
        tl += 128
    return best


# ----------------------------------------------------------------------------
# Kernel 1: [fused previous-BN + ReLU] -> Conv1d('same') + BN partial stats.
# Layout inside the kernel: channels on sublanes, length L on the 128 lanes.
# ----------------------------------------------------------------------------
def _conv_stats_kernel(x_ref, prev_ref, next_ref, w_ref, b_ref, sc_ref, sh_ref,
                       y_ref, st_ref, xh_ref, *, ksize, pad_l, pad_r,
                       apply_pre, precision):
    cdt = xh_ref.dtype
    tl = x_ref.shape[2]
    hb = prev_ref.shape[2]
    l = pl.program_id(1)
    nl = pl.num_programs(1)

    def act(v):
        v = v.astype(jnp.float32)
        if apply_pre:  # previous layer's BatchNorm (per-channel affine) + ReLU
            v = jnp.maximum(v * sc_ref[...] + sh_ref[...], 0.0)
        return v

    OFF = 128  # main tile stored lane-aligned at offset 128 in the halo scratch
    xh_ref[:, OFF:OFF + tl] = act(x_ref[0]).astype(cdt)
    if pad_l > 0:   # left halo = last pad_l cols of the previous L-tile (or 0)
        keep = (l > 0).astype(jnp.float32)
        xh_ref[:, OFF - pad_l:OFF] = (act(prev_ref[0, :, hb - pad_l:]) * keep).astype(cdt)
    if pad_r > 0:   # right halo = first pad_r cols of the next L-tile (or 0)
        keep = (l < nl - 1).astype(jnp.float32)
        xh_ref[:, OFF + tl:OFF + tl + pad_r] = (act(next_ref[0, :, :pad_r]) * keep).astype(cdt)

    # K small MXU matmuls accumulated in f32 (no folded slab build).
    base = OFF - pad_l
    acc = None
    for t in range(ksize):
        xt = xh_ref[:, base + t:base + t + tl]               # (Cin, TL)
        part = jnp.dot(w_ref[t], xt, preferred_element_type=jnp.float32,
                       precision=precision)                  # (Cout, TL) f32
        acc = part if acc is None else acc + part
    y = acc + b_ref[...]                                     # + bias, f32

    y_ref[0] = y.astype(y_ref.dtype)                         # single store (bf16)
    # Merged per-tile BatchNorm partial stats, from the f32 accumulator.
    st_ref[0, 0, :, 0:1] = jnp.sum(y, axis=1, keepdims=True)
    st_ref[0, 0, :, 1:2] = jnp.sum(y * y, axis=1, keepdims=True)


def _conv_with_stats(x, wk, bias, pre_scale, pre_shift, *, ksize, apply_pre,
                     compute_dtype, out_dtype):
    """x: (B, Cin, L) -> (y (B, Cout, L) out_dtype, stats (B, nl, Cout, 2) f32)."""
    B, Cin, L = x.shape
    K, Cout, _ = wk.shape
    assert K == ksize
    pad_l = (ksize - 1) // 2
    pad_r = ksize - 1 - pad_l
    assert pad_l <= 128 and pad_r <= 128, "kernel_size too large for halo scheme"

    vmem_limit = _vmem_limit_bytes()
    tl = _choose_l_tile(L, Cin, Cout, ksize, np.dtype(x.dtype).itemsize,
                        np.dtype(out_dtype).itemsize, int(vmem_limit * 0.8))
    nl = L // tl
    hb = 128 if nl > 1 else tl          # halo fetch width
    assert hb >= pad_l and hb >= pad_r
    r = tl // hb                        # L-tile size in halo-block units
    n_hb = L // hb

    precision = jax.lax.Precision.HIGHEST if compute_dtype == jnp.float32 else None
    kernel = functools.partial(_conv_stats_kernel, ksize=ksize, pad_l=pad_l,
                               pad_r=pad_r, apply_pre=apply_pre,
                               precision=precision)

    y, stats = pl.pallas_call(
        kernel,
        grid=(B, nl),
        in_specs=[
            pl.BlockSpec((1, Cin, tl), lambda b, l: (b, 0, l)),
            pl.BlockSpec((1, Cin, hb),
                         lambda b, l: (b, 0, jnp.maximum(l * r - 1, 0))),
            pl.BlockSpec((1, Cin, hb),
                         lambda b, l: (b, 0, jnp.minimum((l + 1) * r, n_hb - 1))),
            pl.BlockSpec((ksize, Cout, Cin), lambda b, l: (0, 0, 0)),
            pl.BlockSpec((Cout, 1), lambda b, l: (0, 0)),
            pl.BlockSpec((Cin, 1), lambda b, l: (0, 0)),
            pl.BlockSpec((Cin, 1), lambda b, l: (0, 0)),
        ],
        out_specs=[
            pl.BlockSpec((1, Cout, tl), lambda b, l: (b, 0, l)),
            pl.BlockSpec((1, 1, Cout, 2), lambda b, l: (b, l, 0, 0)),
        ],
        out_shape=[
            jax.ShapeDtypeStruct((B, Cout, L), out_dtype),
            jax.ShapeDtypeStruct((B, nl, Cout, 2), jnp.float32),
        ],
        scratch_shapes=[pltpu.VMEM((Cin, tl + 256), compute_dtype)],
        compiler_params=pltpu.CompilerParams(
            dimension_semantics=("parallel", "parallel"),
            vmem_limit_bytes=vmem_limit),
    )(x, x, x,
      wk.astype(compute_dtype),
      bias.reshape(Cout, 1).astype(jnp.float32),
      pre_scale.astype(jnp.float32),
      pre_shift.astype(jnp.float32))
    return y, stats


# ----------------------------------------------------------------------------
# Kernel 2: fused final BatchNorm affine + ReLU epilogue (NCL output, no
# separate transpose pass).
# ----------------------------------------------------------------------------
def _bn_relu_kernel(y_ref, sc_ref, sh_ref, o_ref):
    o_ref[0] = jnp.maximum(
        y_ref[0].astype(jnp.float32) * sc_ref[...] + sh_ref[...], 0.0)


def _bn_relu_epilogue(y, scale, shift):
    B, C, L = y.shape
    vmem_limit = _vmem_limit_bytes()
    tl = _choose_l_tile(L, C, C, 1, np.dtype(y.dtype).itemsize, 4,
                        int(vmem_limit * 0.8))
    nl = L // tl
    return pl.pallas_call(
        _bn_relu_kernel,
        grid=(B, nl),
        in_specs=[
            pl.BlockSpec((1, C, tl), lambda b, l: (b, 0, l)),
            pl.BlockSpec((C, 1), lambda b, l: (0, 0)),
            pl.BlockSpec((C, 1), lambda b, l: (0, 0)),
        ],
        out_specs=pl.BlockSpec((1, C, tl), lambda b, l: (b, 0, l)),
        out_shape=jax.ShapeDtypeStruct((B, C, L), jnp.float32),
        compiler_params=pltpu.CompilerParams(
            dimension_semantics=("parallel", "parallel"),
            vmem_limit_bytes=vmem_limit),
    )(y, scale.astype(jnp.float32), shift.astype(jnp.float32))


# ----------------------------------------------------------------------------
# Tiny JAX glue: reduce per-tile stats -> PyTorch train-mode BN as (scale, shift)
# ----------------------------------------------------------------------------
def _bn_scale_shift(stats, count, gamma, beta, eps=BN_EPS):
    tot = jnp.sum(stats, axis=(0, 1))                  # (C, 2)
    mean = tot[:, 0] / count
    ex2 = tot[:, 1] / count
    var = jnp.maximum(ex2 - mean * mean, 0.0)          # biased variance
    scale = gamma * jax.lax.rsqrt(var + eps)
    shift = beta - mean * scale
    return scale.reshape(-1, 1), shift.reshape(-1, 1)


# ----------------------------------------------------------------------------
# _Unet1DBlock forward (native NCL layout, no boundary transposes)
# ----------------------------------------------------------------------------
def unet1d_block_forward(params, x_ncl, *, eps=BN_EPS,
                         compute_dtype=jnp.bfloat16, storage_dtype=None):
    """x_ncl: (B, initial_filters, L) -> (B, end_filters, L) float32."""
    if storage_dtype is None:
        storage_dtype = compute_dtype
    x = x_ncl.astype(jnp.float32)
    B, Cin, L = x.shape
    n = B * L

    c1, c2 = params["conv1"], params["conv2"]
    k1 = int(c1["wk"].shape[0])
    k2 = int(c2["wk"].shape[0])

    ident_scale = jnp.ones((Cin, 1), jnp.float32)
    ident_shift = jnp.zeros((Cin, 1), jnp.float32)

    # conv1 (+ BN1 partial stats)
    y1, st1 = _conv_with_stats(x, c1["wk"], c1["b"], ident_scale, ident_shift,
                               ksize=k1, apply_pre=False,
                               compute_dtype=compute_dtype, out_dtype=storage_dtype)
    s1, h1 = _bn_scale_shift(st1, n, params["bn1"]["gamma"], params["bn1"]["beta"], eps)

    # BN1+ReLU fused into conv2's input; conv2 (+ BN2 partial stats)
    y2, st2 = _conv_with_stats(y1, c2["wk"], c2["b"], s1, h1,
                               ksize=k2, apply_pre=True,
                               compute_dtype=compute_dtype, out_dtype=storage_dtype)
    s2, h2 = _bn_scale_shift(st2, n, params["bn2"]["gamma"], params["bn2"]["beta"], eps)

    # fused BN2 + ReLU epilogue -> (B, end_filters, L) f32
    return _bn_relu_epilogue(y2, s2, h2)


# ----------------------------------------------------------------------------
# Parameter construction (deterministic, mirrors PyTorch defaults)
# ----------------------------------------------------------------------------
def _make_conv(key, cin, cout, k):
    kw, kb = jax.random.split(key)
    bound = 1.0 / np.sqrt(cin * k)
    w = jax.random.uniform(kw, (cout, cin, k), jnp.float32, -bound, bound)  # torch layout
    b = jax.random.uniform(kb, (cout,), jnp.float32, -bound, bound)
    return {"w": w, "wk": jnp.transpose(w, (2, 0, 1)), "b": b}   # wk: (K, Cout, Cin)


def _make_bn(c):
    return {"gamma": jnp.ones((c,), jnp.float32), "beta": jnp.zeros((c,), jnp.float32)}


def init_unet1d_block(key, initial_filters, end_filters, kernel_size,
                      in_middle_filters=None):
    mid = end_filters if in_middle_filters is None else in_middle_filters
    k1, k2 = jax.random.split(key)
    return {"conv1": _make_conv(k1, initial_filters, mid, kernel_size),
            "bn1": _make_bn(mid),
            "conv2": _make_conv(k2, mid, end_filters, kernel_size),
            "bn2": _make_bn(end_filters)}


# ----------------------------------------------------------------------------
# Pure-JAX f32 reference (PyTorch semantics) for correctness checks
# ----------------------------------------------------------------------------
def _ref_conv(x, w_oik, bias):
    Cout, Cin, K = w_oik.shape
    L = x.shape[-1]
    pad_l = (K - 1) // 2
    pad_r = K - 1 - pad_l
    xp = jnp.pad(x, ((0, 0), (0, 0), (pad_l, pad_r)))
    y = sum(jnp.einsum("bcl,oc->bol", xp[:, :, t:t + L], w_oik[:, :, t])
            for t in range(K))
    return y + bias[None, :, None]


def _reference_forward(params, x, eps=BN_EPS):
    def block(h, conv, bn):
        y = _ref_conv(h, conv["w"], conv["b"])
        mean = jnp.mean(y, axis=(0, 2), keepdims=True)
        var = jnp.mean((y - mean) ** 2, axis=(0, 2), keepdims=True)
        yn = (y - mean) * jax.lax.rsqrt(var + eps)
        return jnp.maximum(yn * bn["gamma"][None, :, None] + bn["beta"][None, :, None], 0.0)

    h = block(x, params["conv1"], params["bn1"])
    return block(h, params["conv2"], params["bn2"])


# ----------------------------------------------------------------------------
if __name__ == "__main__":
    BATCH = 2
    INITIAL_FILTERS = 4
    MID_FILTERS = 8
    END_FILTERS = 8
    KERNEL_SIZE = 3
    LENGTH = 16

    key = jax.random.PRNGKey(0)
    kx, kp = jax.random.split(key)
    x = jax.random.normal(kx, (BATCH, INITIAL_FILTERS, LENGTH), jnp.float32)
    params = init_unet1d_block(kp, INITIAL_FILTERS, END_FILTERS, KERNEL_SIZE,
                               in_middle_filters=MID_FILTERS)

    ref = _reference_forward(params, x)

    # f32 compute/storage path: tight correctness check.
    fwd_f32 = jax.jit(functools.partial(unet1d_block_forward,
                                        compute_dtype=jnp.float32,
                                        storage_dtype=jnp.float32))
    out_f32 = jax.block_until_ready(fwd_f32(params, x))
    assert out_f32.shape == (BATCH, END_FILTERS, LENGTH), out_f32.shape
    err_f32 = float(jnp.max(jnp.abs(out_f32 - ref)))
    assert err_f32 < 1e-3, f"f32 path max abs error vs reference: {err_f32}"

    # Default performance path (bf16 MXU + bf16 intermediates).
    fwd = jax.jit(unet1d_block_forward)
    out = jax.block_until_ready(fwd(params, x))
    assert out.shape == (BATCH, END_FILTERS, LENGTH), out.shape
    assert bool(jnp.all(jnp.isfinite(out)))
    err = float(jnp.max(jnp.abs(out - ref)))
    assert err < 6e-2, f"bf16 path max abs error vs reference: {err}"

    print("KERNEL_OK")
</pallas_src>

<mosaic_0001>
module attributes {stable_mosaic.version = 11 : i64} {
  func.func @_conv_stats_kernel(%arg0: i32, %arg1: i32, %arg2: memref<1x4x16xf32, #tpu.memory_space<vmem>>, %arg3: memref<1x4x16xf32, #tpu.memory_space<vmem>>, %arg4: memref<1x4x16xf32, #tpu.memory_space<vmem>>, %arg5: memref<3x8x4xf32, #tpu.memory_space<vmem>>, %arg6: memref<8x1xf32, #tpu.memory_space<vmem>>, %arg7: memref<4x1xf32, #tpu.memory_space<vmem>>, %arg8: memref<4x1xf32, #tpu.memory_space<vmem>>, %arg9: memref<1x8x16xf32, #tpu.memory_space<vmem>>, %arg10: memref<1x1x8x2xf32, #tpu.memory_space<vmem>>, %arg11: memref<4x272xf32, #tpu.memory_space<vmem>>) attributes {dimension_semantics = [#tpu.dimension_semantics<parallel>, #tpu.dimension_semantics<parallel>], iteration_bounds = array<i64: 2, 1>, scalar_prefetch = 0 : i64, scratch_operands = 1 : i64, tpu.core_type = #tpu.core_type<tc>, window_params = [{transform_indices = @transform_0, window_bounds = array<i64: 1, 4, 16>}, {transform_indices = @transform_1, window_bounds = array<i64: 1, 4, 16>}, {transform_indices = @transform_2, window_bounds = array<i64: 1, 4, 16>}, {pipeline_mode = #tpu.pipeline_mode<synchronous>, transform_indices = @transform_3, window_bounds = array<i64: 3, 8, 4>}, {pipeline_mode = #tpu.pipeline_mode<synchronous>, transform_indices = @transform_4, window_bounds = array<i64: 8, 1>}, {pipeline_mode = #tpu.pipeline_mode<synchronous>, transform_indices = @transform_5, window_bounds = array<i64: 4, 1>}, {pipeline_mode = #tpu.pipeline_mode<synchronous>, transform_indices = @transform_6, window_bounds = array<i64: 4, 1>}, {transform_indices = @transform_7, window_bounds = array<i64: 1, 8, 16>}, {transform_indices = @transform_8, window_bounds = array<i64: 1, 1, 8, 2>}]} {
    %c0 = arith.constant 0 : index
    %c0_0 = arith.constant 0 : index
    %c0_1 = arith.constant 0 : index
    %0 = vector.load %arg2[%c0, %c0_0, %c0_1] : memref<1x4x16xf32, #tpu.memory_space<vmem>>, vector<1x4x16xf32>
    %1 = vector.shape_cast %0 : vector<1x4x16xf32> to vector<4x16xf32>
    %c0_2 = arith.constant 0 : index
    %c128 = arith.constant 128 : index
    %2 = vector.load %arg11[%c0_2, %c128] : memref<4x272xf32, #tpu.memory_space<vmem>>, vector<4x16xf32>
    tpu.vector_store %arg11[%c0_2, %c128], %1 {strides = array<i32>} : memref<4x272xf32, #tpu.memory_space<vmem>>, vector<4x16xf32>,
    %c0_i32 = arith.constant 0 : i32
    %3 = arith.cmpi sgt, %arg1, %c0_i32 : i32
    %4 = arith.extui %3 : i1 to i32
    %5 = arith.sitofp %4 : i32 to f32
    %c0_3 = arith.constant 0 : index
    %c0_4 = arith.constant 0 : index
    %c15 = arith.constant 15 : index
    %6 = vector.load %arg3[%c0_3, %c0_4, %c15] : memref<1x4x16xf32, #tpu.memory_space<vmem>>, vector<1x4x1xf32>
    %7 = vector.shape_cast %6 : vector<1x4x1xf32> to vector<4x1xf32>
    %8 = vector.broadcast %5 : f32 to vector<4x1xf32>
    %9 = arith.mulf %7, %8 : vector<4x1xf32>
    %c0_5 = arith.constant 0 : index
    %c127 = arith.constant 127 : index
    %10 = vector.load %arg11[%c0_5, %c127] : memref<4x272xf32, #tpu.memory_space<vmem>>, vector<4x1xf32>
    tpu.vector_store %arg11[%c0_5, %c127], %9 {strides = array<i32>} : memref<4x272xf32, #tpu.memory_space<vmem>>, vector<4x1xf32>,
    %c0_i32_6 = arith.constant 0 : i32
    %11 = arith.cmpi slt, %arg1, %c0_i32_6 : i32
    %12 = arith.extui %11 : i1 to i32
    %13 = arith.sitofp %12 : i32 to f32
    %c0_7 = arith.constant 0 : index
    %c0_8 = arith.constant 0 : index
    %c0_9 = arith.constant 0 : index
    %14 = vector.load %arg4[%c0_7, %c0_8, %c0_9] : memref<1x4x16xf32, #tpu.memory_space<vmem>>, vector<1x4x1xf32>
    %15 = vector.shape_cast %14 : vector<1x4x1xf32> to vector<4x1xf32>
    %16 = vector.broadcast %13 : f32 to vector<4x1xf32>
    %17 = arith.mulf %15, %16 : vector<4x1xf32>
    %c0_10 = arith.constant 0 : index
    %c144 = arith.constant 144 : index
    %18 = vector.load %arg11[%c0_10, %c144] : memref<4x272xf32, #tpu.memory_space<vmem>>, vector<4x1xf32>
    tpu.vector_store %arg11[%c0_10, %c144], %17 {strides = array<i32>} : memref<4x272xf32, #tpu.memory_space<vmem>>, vector<4x1xf32>,
    %c0_11 = arith.constant 0 : index
    %c127_12 = arith.constant 127 : index
    %19 = vector.load %arg11[%c0_11, %c127_12] : memref<4x272xf32, #tpu.memory_space<vmem>>, vector<4x16xf32>
    %c0_13 = arith.constant 0 : index
    %c0_14 = arith.constant 0 : index
    %c0_15 = arith.constant 0 : index
    %20 = vector.load %arg5[%c0_13, %c0_14, %c0_15] : memref<3x8x4xf32, #tpu.memory_space<vmem>>, vector<1x8x4xf32>
    %21 = vector.shape_cast %20 : vector<1x8x4xf32> to vector<8x4xf32>
    %cst = arith.constant dense<0.000000e+00> : vector<8x16xf32>
    %22 = tpu.matmul %21, %19, %cst {dimension_numbers = #tpu.dot_dimension_numbers<[1], [0], [0], [1], [0, 0, 1, 1], [], []>, precision = #tpu.contract_precision<fp32>} : vector<8x4xf32>, vector<4x16xf32>, vector<8x16xf32> -> vector<8x16xf32>
    %c0_16 = arith.constant 0 : index
    %c128_17 = arith.constant 128 : index
    %23 = vector.load %arg11[%c0_16, %c128_17] : memref<4x272xf32, #tpu.memory_space<vmem>>, vector<4x16xf32>
    %c1 = arith.constant 1 : index
    %c0_18 = arith.constant 0 : index
    %c0_19 = arith.constant 0 : index
    %24 = vector.load %arg5[%c1, %c0_18, %c0_19] : memref<3x8x4xf32, #tpu.memory_space<vmem>>, vector<1x8x4xf32>
    %25 = vector.shape_cast %24 : vector<1x8x4xf32> to vector<8x4xf32>
    %cst_20 = arith.constant dense<0.000000e+00> : vector<8x16xf32>
    %26 = tpu.matmul %25, %23, %cst_20 {dimension_numbers = #tpu.dot_dimension_numbers<[1], [0], [0], [1], [0, 0, 1, 1], [], []>, precision = #tpu.contract_precision<fp32>} : vector<8x4xf32>, vector<4x16xf32>, vector<8x16xf32> -> vector<8x16xf32>
    %27 = arith.addf %22, %26 : vector<8x16xf32>
    %c0_21 = arith.constant 0 : index
    %c129 = arith.constant 129 : index
    %28 = vector.load %arg11[%c0_21, %c129] : memref<4x272xf32, #tpu.memory_space<vmem>>, vector<4x16xf32>
    %c2 = arith.constant 2 : index
    %c0_22 = arith.constant 0 : index
    %c0_23 = arith.constant 0 : index
    %29 = vector.load %arg5[%c2, %c0_22, %c0_23] : memref<3x8x4xf32, #tpu.memory_space<vmem>>, vector<1x8x4xf32>
    %30 = vector.shape_cast %29 : vector<1x8x4xf32> to vector<8x4xf32>
    %cst_24 = arith.constant dense<0.000000e+00> : vector<8x16xf32>
    %31 = tpu.matmul %30, %28, %cst_24 {dimension_numbers = #tpu.dot_dimension_numbers<[1], [0], [0], [1], [0, 0, 1, 1], [], []>, precision = #tpu.contract_precision<fp32>} : vector<8x4xf32>, vector<4x16xf32>, vector<8x16xf32> -> vector<8x16xf32>
    %32 = arith.addf %27, %31 : vector<8x16xf32>
    %c0_25 = arith.constant 0 : index
    %c0_26 = arith.constant 0 : index
    %33 = vector.load %arg6[%c0_25, %c0_26] : memref<8x1xf32, #tpu.memory_space<vmem>>, vector<8x1xf32>
    %34 = vector.broadcast %33 : vector<8x1xf32> to vector<8x16xf32>
    %35 = arith.addf %32, %34 : vector<8x16xf32>
    %c0_27 = arith.constant 0 : index
    %c0_28 = arith.constant 0 : index
    %c0_29 = arith.constant 0 : index
    %36 = vector.load %arg9[%c0_27, %c0_28, %c0_29] : memref<1x8x16xf32, #tpu.memory_space<vmem>>, vector<1x8x16xf32>
    %37 = vector.shape_cast %36 : vector<1x8x16xf32> to vector<8x16xf32>
    %38 = vector.shape_cast %35 : vector<8x16xf32> to vector<1x8x16xf32>
    tpu.vector_store %arg9[%c0_27, %c0_28, %c0_29], %38 {strides = array<i32>} : memref<1x8x16xf32, #tpu.memory_space<vmem>>, vector<1x8x16xf32>,
    %cst_30 = arith.constant dense<0.000000e+00> : vector<8xf32>
    %39 = vector.multi_reduction <add>, %35, %cst_30 [1] : vector<8x16xf32> to vector<8xf32>
    %40 = vector.shape_cast %39 : vector<8xf32> to vector<8x1xf32>
    %c0_31 = arith.constant 0 : index
    %c0_32 = arith.constant 0 : index
    %c0_33 = arith.constant 0 : index
    %c0_34 = arith.constant 0 : index
    %41 = vector.load %arg10[%c0_31, %c0_32, %c0_33, %c0_34] : memref<1x1x8x2xf32, #tpu.memory_space<vmem>>, vector<1x1x8x1xf32>
    %42 = vector.shape_cast %41 : vector<1x1x8x1xf32> to vector<8x1xf32>
    %43 = vector.shape_cast %40 : vector<8x1xf32> to vector<1x1x8x1xf32>
    tpu.vector_store %arg10[%c0_31, %c0_32, %c0_33, %c0_34], %43 {strides = array<i32>} : memref<1x1x8x2xf32, #tpu.memory_space<vmem>>, vector<1x1x8x1xf32>,
    %44 = arith.mulf %35, %35 : vector<8x16xf32>
    %cst_35 = arith.constant dense<0.000000e+00> : vector<8xf32>
    %45 = vector.multi_reduction <add>, %44, %cst_35 [1] : vector<8x16xf32> to vector<8xf32>
    %46 = vector.shape_cast %45 : vector<8xf32> to vector<8x1xf32>
    %c0_36 = arith.constant 0 : index
    %c0_37 = arith.constant 0 : index
    %c0_38 = arith.constant 0 : index
    %c1_39 = arith.constant 1 : index
    %47 = vector.load %arg10[%c0_36, %c0_37, %c0_38, %c1_39] : memref<1x1x8x2xf32, #tpu.memory_space<vmem>>, vector<1x1x8x1xf32>
    %48 = vector.shape_cast %47 : vector<1x1x8x1xf32> to vector<8x1xf32>
    %49 = vector.shape_cast %46 : vector<8x1xf32> to vector<1x1x8x1xf32>
    tpu.vector_store %arg10[%c0_36, %c0_37, %c0_38, %c1_39], %49 {strides = array<i32>} : memref<1x1x8x2xf32, #tpu.memory_space<vmem>>, vector<1x1x8x1xf32>,
    return
  }
  func.func @transform_0(%arg0: i32, %arg1: i32) -> (i32, i32, i32) {
    %c0_i32 = arith.constant 0 : i32
    %c0_i32_0 = arith.constant 0 : i32
    return %arg0, %c0_i32, %arg1 : i32, i32, i32
  }
  func.func @transform_1(%arg0: i32, %arg1: i32) -> (i32, i32, i32) {
    %c1_i32 = arith.constant 1 : i32
    %0 = arith.muli %arg1, %c1_i32 : i32
    %c1_i32_0 = arith.constant 1 : i32
    %1 = arith.subi %0, %c1_i32_0 : i32
    %c0_i32 = arith.constant 0 : i32
    %2 = arith.maxsi %1, %c0_i32 : i32
    %c0_i32_1 = arith.constant 0 : i32
    %c0_i32_2 = arith.constant 0 : i32
    return %arg0, %c0_i32_1, %2 : i32, i32, i32
  }
  func.func @transform_2(%arg0: i32, %arg1: i32) -> (i32, i32, i32) {
    %c1_i32 = arith.constant 1 : i32
    %0 = arith.addi %arg1, %c1_i32 : i32
    %c1_i32_0 = arith.constant 1 : i32
    %1 = arith.muli %0, %c1_i32_0 : i32
    %c0_i32 = arith.constant 0 : i32
    %2 = arith.minsi %1, %c0_i32 : i32
    %c0_i32_1 = arith.constant 0 : i32
    %c0_i32_2 = arith.constant 0 : i32
    return %arg0, %c0_i32_1, %2 : i32, i32, i32
  }
  func.func @transform_3(%arg0: i32, %arg1: i32) -> (i32, i32, i32) {
    %c0_i32 = arith.constant 0 : i32
    %c0_i32_0 = arith.constant 0 : i32
    %c0_i32_1 = arith.constant 0 : i32
    %c0_i32_2 = arith.constant 0 : i32
    return %c0_i32, %c0_i32_0, %c0_i32_1 : i32, i32, i32
  }
  func.func @transform_4(%arg0: i32, %arg1: i32) -> (i32, i32) {
    %c0_i32 = arith.constant 0 : i32
    %c0_i32_0 = arith.constant 0 : i32
    %c0_i32_1 = arith.constant 0 : i32
    return %c0_i32, %c0_i32_0 : i32, i32
  }
  func.func @transform_5(%arg0: i32, %arg1: i32) -> (i32, i32) {
    %c0_i32 = arith.constant 0 : i32
    %c0_i32_0 = arith.constant 0 : i32
    %c0_i32_1 = arith.constant 0 : i32
    return %c0_i32, %c0_i32_0 : i32, i32
  }
  func.func @transform_6(%arg0: i32, %arg1: i32) -> (i32, i32) {
    %c0_i32 = arith.constant 0 : i32
    %c0_i32_0 = arith.constant 0 : i32
    %c0_i32_1 = arith.constant 0 : i32
    return %c0_i32, %c0_i32_0 : i32, i32
  }
  func.func @transform_7(%arg0: i32, %arg1: i32) -> (i32, i32, i32) {
    %c0_i32 = arith.constant 0 : i32
    %c0_i32_0 = arith.constant 0 : i32
    return %arg0, %c0_i32, %arg1 : i32, i32, i32
  }
  func.func @transform_8(%arg0: i32, %arg1: i32) -> (i32, i32, i32, i32) {
    %c0_i32 = arith.constant 0 : i32
    %c0_i32_0 = arith.constant 0 : i32
    %c0_i32_1 = arith.constant 0 : i32
    return %arg0, %arg1, %c0_i32, %c0_i32_0 : i32, i32, i32, i32
  }
}

module attributes {stable_mosaic.version = 11 : i64} {
  func.func @_conv_stats_kernel(%arg0: i32, %arg1: i32, %arg2: memref<1x8x16xf32, #tpu.memory_space<vmem>>, %arg3: memref<1x8x16xf32, #tpu.memory_space<vmem>>, %arg4: memref<1x8x16xf32, #tpu.memory_space<vmem>>, %arg5: memref<3x8x8xf32, #tpu.memory_space<vmem>>, %arg6: memref<8x1xf32, #tpu.memory_space<vmem>>, %arg7: memref<8x1xf32, #tpu.memory_space<vmem>>, %arg8: memref<8x1xf32, #tpu.memory_space<vmem>>, %arg9: memref<1x8x16xf32, #tpu.memory_space<vmem>>, %arg10: memref<1x1x8x2xf32, #tpu.memory_space<vmem>>, %arg11: memref<8x272xf32, #tpu.memory_space<vmem>>) attributes {dimension_semantics = [#tpu.dimension_semantics<parallel>, #tpu.dimension_semantics<parallel>], iteration_bounds = array<i64: 2, 1>, scalar_prefetch = 0 : i64, scratch_operands = 1 : i64, tpu.core_type = #tpu.core_type<tc>, window_params = [{transform_indices = @transform_0, window_bounds = array<i64: 1, 8, 16>}, {transform_indices = @transform_1, window_bounds = array<i64: 1, 8, 16>}, {transform_indices = @transform_2, window_bounds = array<i64: 1, 8, 16>}, {pipeline_mode = #tpu.pipeline_mode<synchronous>, transform_indices = @transform_3, window_bounds = array<i64: 3, 8, 8>}, {pipeline_mode = #tpu.pipeline_mode<synchronous>, transform_indices = @transform_4, window_bounds = array<i64: 8, 1>}, {pipeline_mode = #tpu.pipeline_mode<synchronous>, transform_indices = @transform_5, window_bounds = array<i64: 8, 1>}, {pipeline_mode = #tpu.pipeline_mode<synchronous>, transform_indices = @transform_6, window_bounds = array<i64: 8, 1>}, {transform_indices = @transform_7, window_bounds = array<i64: 1, 8, 16>}, {transform_indices = @transform_8, window_bounds = array<i64: 1, 1, 8, 2>}]} {
    %c0 = arith.constant 0 : index
    %c0_0 = arith.constant 0 : index
    %c0_1 = arith.constant 0 : index
    %0 = vector.load %arg2[%c0, %c0_0, %c0_1] : memref<1x8x16xf32, #tpu.memory_space<vmem>>, vector<1x8x16xf32>
    %1 = vector.shape_cast %0 : vector<1x8x16xf32> to vector<8x16xf32>
    %c0_2 = arith.constant 0 : index
    %c0_3 = arith.constant 0 : index
    %2 = vector.load %arg7[%c0_2, %c0_3] : memref<8x1xf32, #tpu.memory_space<vmem>>, vector<8x1xf32>
    %3 = vector.broadcast %2 : vector<8x1xf32> to vector<8x16xf32>
    %4 = arith.mulf %1, %3 : vector<8x16xf32>
    %c0_4 = arith.constant 0 : index
    %c0_5 = arith.constant 0 : index
    %5 = vector.load %arg8[%c0_4, %c0_5] : memref<8x1xf32, #tpu.memory_space<vmem>>, vector<8x1xf32>
    %6 = vector.broadcast %5 : vector<8x1xf32> to vector<8x16xf32>
    %7 = arith.addf %4, %6 : vector<8x16xf32>
    %cst = arith.constant 0.000000e+00 : f32
    %8 = vector.broadcast %cst : f32 to vector<8x16xf32>
    %9 = arith.maximumf %7, %8 : vector<8x16xf32>
    %c0_6 = arith.constant 0 : index
    %c128 = arith.constant 128 : index
    %10 = vector.load %arg11[%c0_6, %c128] : memref<8x272xf32, #tpu.memory_space<vmem>>, vector<8x16xf32>
    tpu.vector_store %arg11[%c0_6, %c128], %9 {strides = array<i32>} : memref<8x272xf32, #tpu.memory_space<vmem>>, vector<8x16xf32>,
    %c0_i32 = arith.constant 0 : i32
    %11 = arith.cmpi sgt, %arg1, %c0_i32 : i32
    %12 = arith.extui %11 : i1 to i32
    %13 = arith.sitofp %12 : i32 to f32
    %c0_7 = arith.constant 0 : index
    %c0_8 = arith.constant 0 : index
    %c15 = arith.constant 15 : index
    %14 = vector.load %arg3[%c0_7, %c0_8, %c15] : memref<1x8x16xf32, #tpu.memory_space<vmem>>, vector<1x8x1xf32>
    %15 = vector.shape_cast %14 : vector<1x8x1xf32> to vector<8x1xf32>
    %c0_9 = arith.constant 0 : index
    %c0_10 = arith.constant 0 : index
    %16 = vector.load %arg7[%c0_9, %c0_10] : memref<8x1xf32, #tpu.memory_space<vmem>>, vector<8x1xf32>
    %17 = arith.mulf %15, %16 : vector<8x1xf32>
    %c0_11 = arith.constant 0 : index
    %c0_12 = arith.constant 0 : index
    %18 = vector.load %arg8[%c0_11, %c0_12] : memref<8x1xf32, #tpu.memory_space<vmem>>, vector<8x1xf32>
    %19 = arith.addf %17, %18 : vector<8x1xf32>
    %cst_13 = arith.constant 0.000000e+00 : f32
    %20 = vector.broadcast %cst_13 : f32 to vector<8x1xf32>
    %21 = arith.maximumf %19, %20 : vector<8x1xf32>
    %22 = vector.broadcast %13 : f32 to vector<8x1xf32>
    %23 = arith.mulf %21, %22 : vector<8x1xf32>
    %c0_14 = arith.constant 0 : index
    %c127 = arith.constant 127 : index
    %24 = vector.load %arg11[%c0_14, %c127] : memref<8x272xf32, #tpu.memory_space<vmem>>, vector<8x1xf32>
    tpu.vector_store %arg11[%c0_14, %c127], %23 {strides = array<i32>} : memref<8x272xf32, #tpu.memory_space<vmem>>, vector<8x1xf32>,
    %c0_i32_15 = arith.constant 0 : i32
    %25 = arith.cmpi slt, %arg1, %c0_i32_15 : i32
    %26 = arith.extui %25 : i1 to i32
    %27 = arith.sitofp %26 : i32 to f32
    %c0_16 = arith.constant 0 : index
    %c0_17 = arith.constant 0 : index
    %c0_18 = arith.constant 0 : index
    %28 = vector.load %arg4[%c0_16, %c0_17, %c0_18] : memref<1x8x16xf32, #tpu.memory_space<vmem>>, vector<1x8x1xf32>
    %29 = vector.shape_cast %28 : vector<1x8x1xf32> to vector<8x1xf32>
    %c0_19 = arith.constant 0 : index
    %c0_20 = arith.constant 0 : index
    %30 = vector.load %arg7[%c0_19, %c0_20] : memref<8x1xf32, #tpu.memory_space<vmem>>, vector<8x1xf32>
    %31 = arith.mulf %29, %30 : vector<8x1xf32>
    %c0_21 = arith.constant 0 : index
    %c0_22 = arith.constant 0 : index
    %32 = vector.load %arg8[%c0_21, %c0_22] : memref<8x1xf32, #tpu.memory_space<vmem>>, vector<8x1xf32>
    %33 = arith.addf %31, %32 : vector<8x1xf32>
    %cst_23 = arith.constant 0.000000e+00 : f32
    %34 = vector.broadcast %cst_23 : f32 to vector<8x1xf32>
    %35 = arith.maximumf %33, %34 : vector<8x1xf32>
    %36 = vector.broadcast %27 : f32 to vector<8x1xf32>
    %37 = arith.mulf %35, %36 : vector<8x1xf32>
    %c0_24 = arith.constant 0 : index
    %c144 = arith.constant 144 : index
    %38 = vector.load %arg11[%c0_24, %c144] : memref<8x272xf32, #tpu.memory_space<vmem>>, vector<8x1xf32>
    tpu.vector_store %arg11[%c0_24, %c144], %37 {strides = array<i32>} : memref<8x272xf32, #tpu.memory_space<vmem>>, vector<8x1xf32>,
    %c0_25 = arith.constant 0 : index
    %c127_26 = arith.constant 127 : index
    %39 = vector.load %arg11[%c0_25, %c127_26] : memref<8x272xf32, #tpu.memory_space<vmem>>, vector<8x16xf32>
    %c0_27 = arith.constant 0 : index
    %c0_28 = arith.constant 0 : index
    %c0_29 = arith.constant 0 : index
    %40 = vector.load %arg5[%c0_27, %c0_28, %c0_29] : memref<3x8x8xf32, #tpu.memory_space<vmem>>, vector<1x8x8xf32>
    %41 = vector.shape_cast %40 : vector<1x8x8xf32> to vector<8x8xf32>
    %cst_30 = arith.constant dense<0.000000e+00> : vector<8x16xf32>
    %42 = tpu.matmul %41, %39, %cst_30 {dimension_numbers = #tpu.dot_dimension_numbers<[1], [0], [0], [1], [0, 0, 1, 1], [], []>, precision = #tpu.contract_precision<fp32>} : vector<8x8xf32>, vector<8x16xf32>, vector<8x16xf32> -> vector<8x16xf32>
    %c0_31 = arith.constant 0 : index
    %c128_32 = arith.constant 128 : index
    %43 = vector.load %arg11[%c0_31, %c128_32] : memref<8x272xf32, #tpu.memory_space<vmem>>, vector<8x16xf32>
    %c1 = arith.constant 1 : index
    %c0_33 = arith.constant 0 : index
    %c0_34 = arith.constant 0 : index
    %44 = vector.load %arg5[%c1, %c0_33, %c0_34] : memref<3x8x8xf32, #tpu.memory_space<vmem>>, vector<1x8x8xf32>
    %45 = vector.shape_cast %44 : vector<1x8x8xf32> to vector<8x8xf32>
    %cst_35 = arith.constant dense<0.000000e+00> : vector<8x16xf32>
    %46 = tpu.matmul %45, %43, %cst_35 {dimension_numbers = #tpu.dot_dimension_numbers<[1], [0], [0], [1], [0, 0, 1, 1], [], []>, precision = #tpu.contract_precision<fp32>} : vector<8x8xf32>, vector<8x16xf32>, vector<8x16xf32> -> vector<8x16xf32>
    %47 = arith.addf %42, %46 : vector<8x16xf32>
    %c0_36 = arith.constant 0 : index
    %c129 = arith.constant 129 : index
    %48 = vector.load %arg11[%c0_36, %c129] : memref<8x272xf32, #tpu.memory_space<vmem>>, vector<8x16xf32>
    %c2 = arith.constant 2 : index
    %c0_37 = arith.constant 0 : index
    %c0_38 = arith.constant 0 : index
    %49 = vector.load %arg5[%c2, %c0_37, %c0_38] : memref<3x8x8xf32, #tpu.memory_space<vmem>>, vector<1x8x8xf32>
    %50 = vector.shape_cast %49 : vector<1x8x8xf32> to vector<8x8xf32>
    %cst_39 = arith.constant dense<0.000000e+00> : vector<8x16xf32>
    %51 = tpu.matmul %50, %48, %cst_39 {dimension_numbers = #tpu.dot_dimension_numbers<[1], [0], [0], [1], [0, 0, 1, 1], [], []>, precision = #tpu.contract_precision<fp32>} : vector<8x8xf32>, vector<8x16xf32>, vector<8x16xf32> -> vector<8x16xf32>
    %52 = arith.addf %47, %51 : vector<8x16xf32>
    %c0_40 = arith.constant 0 : index
    %c0_41 = arith.constant 0 : index
    %53 = vector.load %arg6[%c0_40, %c0_41] : memref<8x1xf32, #tpu.memory_space<vmem>>, vector<8x1xf32>
    %54 = vector.broadcast %53 : vector<8x1xf32> to vector<8x16xf32>
    %55 = arith.addf %52, %54 : vector<8x16xf32>
    %c0_42 = arith.constant 0 : index
    %c0_43 = arith.constant 0 : index
    %c0_44 = arith.constant 0 : index
    %56 = vector.load %arg9[%c0_42, %c0_43, %c0_44] : memref<1x8x16xf32, #tpu.memory_space<vmem>>, vector<1x8x16xf32>
    %57 = vector.shape_cast %56 : vector<1x8x16xf32> to vector<8x16xf32>
    %58 = vector.shape_cast %55 : vector<8x16xf32> to vector<1x8x16xf32>
    tpu.vector_store %arg9[%c0_42, %c0_43, %c0_44], %58 {strides = array<i32>} : memref<1x8x16xf32, #tpu.memory_space<vmem>>, vector<1x8x16xf32>,
    %cst_45 = arith.constant dense<0.000000e+00> : vector<8xf32>
    %59 = vector.multi_reduction <add>, %55, %cst_45 [1] : vector<8x16xf32> to vector<8xf32>
    %60 = vector.shape_cast %59 : vector<8xf32> to vector<8x1xf32>
    %c0_46 = arith.constant 0 : index
    %c0_47 = arith.constant 0 : index
    %c0_48 = arith.constant 0 : index
    %c0_49 = arith.constant 0 : index
    %61 = vector.load %arg10[%c0_46, %c0_47, %c0_48, %c0_49] : memref<1x1x8x2xf32, #tpu.memory_space<vmem>>, vector<1x1x8x1xf32>
    %62 = vector.shape_cast %61 : vector<1x1x8x1xf32> to vector<8x1xf32>
    %63 = vector.shape_cast %60 : vector<8x1xf32> to vector<1x1x8x1xf32>
    tpu.vector_store %arg10[%c0_46, %c0_47, %c0_48, %c0_49], %63 {strides = array<i32>} : memref<1x1x8x2xf32, #tpu.memory_space<vmem>>, vector<1x1x8x1xf32>,
    %64 = arith.mulf %55, %55 : vector<8x16xf32>
    %cst_50 = arith.constant dense<0.000000e+00> : vector<8xf32>
    %65 = vector.multi_reduction <add>, %64, %cst_50 [1] : vector<8x16xf32> to vector<8xf32>
    %66 = vector.shape_cast %65 : vector<8xf32> to vector<8x1xf32>
    %c0_51 = arith.constant 0 : index
    %c0_52 = arith.constant 0 : index
    %c0_53 = arith.constant 0 : index
    %c1_54 = arith.constant 1 : index
    %67 = vector.load %arg10[%c0_51, %c0_52, %c0_53, %c1_54] : memref<1x1x8x2xf32, #tpu.memory_space<vmem>>, vector<1x1x8x1xf32>
    %68 = vector.shape_cast %67 : vector<1x1x8x1xf32> to vector<8x1xf32>
    %69 = vector.shape_cast %66 : vector<8x1xf32> to vector<1x1x8x1xf32>
    tpu.vector_store %arg10[%c0_51, %c0_52, %c0_53, %c1_54], %69 {strides = array<i32>} : memref<1x1x8x2xf32, #tpu.memory_space<vmem>>, vector<1x1x8x1xf32>,
    return
  }
  func.func @transform_0(%arg0: i32, %arg1: i32) -> (i32, i32, i32) {
    %c0_i32 = arith.constant 0 : i32
    %c0_i32_0 = arith.constant 0 : i32
    return %arg0, %c0_i32, %arg1 : i32, i32, i32
  }
  func.func @transform_1(%arg0: i32, %arg1: i32) -> (i32, i32, i32) {
    %c1_i32 = arith.constant 1 : i32
    %0 = arith.muli %arg1, %c1_i32 : i32
    %c1_i32_0 = arith.constant 1 : i32
    %1 = arith.subi %0, %c1_i32_0 : i32
    %c0_i32 = arith.constant 0 : i32
    %2 = arith.maxsi %1, %c0_i32 : i32
    %c0_i32_1 = arith.constant 0 : i32
    %c0_i32_2 = arith.constant 0 : i32
    return %arg0, %c0_i32_1, %2 : i32, i32, i32
  }
  func.func @transform_2(%arg0: i32, %arg1: i32) -> (i32, i32, i32) {
    %c1_i32 = arith.constant 1 : i32
    %0 = arith.addi %arg1, %c1_i32 : i32
    %c1_i32_0 = arith.constant 1 : i32
    %1 = arith.muli %0, %c1_i32_0 : i32
    %c0_i32 = arith.constant 0 : i32
    %2 = arith.minsi %1, %c0_i32 : i32
    %c0_i32_1 = arith.constant 0 : i32
    %c0_i32_2 = arith.constant 0 : i32
    return %arg0, %c0_i32_1, %2 : i32, i32, i32
  }
  func.func @transform_3(%arg0: i32, %arg1: i32) -> (i32, i32, i32) {
    %c0_i32 = arith.constant 0 : i32
    %c0_i32_0 = arith.constant 0 : i32
    %c0_i32_1 = arith.constant 0 : i32
    %c0_i32_2 = arith.constant 0 : i32
    return %c0_i32, %c0_i32_0, %c0_i32_1 : i32, i32, i32
  }
  func.func @transform_4(%arg0: i32, %arg1: i32) -> (i32, i32) {
    %c0_i32 = arith.constant 0 : i32
    %c0_i32_0 = arith.constant 0 : i32
    %c0_i32_1 = arith.constant 0 : i32
    return %c0_i32, %c0_i32_0 : i32, i32
  }
  func.func @transform_5(%arg0: i32, %arg1: i32) -> (i32, i32) {
    %c0_i32 = arith.constant 0 : i32
    %c0_i32_0 = arith.constant 0 : i32
    %c0_i32_1 = arith.constant 0 : i32
    return %c0_i32, %c0_i32_0 : i32, i32
  }
  func.func @transform_6(%arg0: i32, %arg1: i32) -> (i32, i32) {
    %c0_i32 = arith.constant 0 : i32
    %c0_i32_0 = arith.constant 0 : i32
    %c0_i32_1 = arith.constant 0 : i32
    return %c0_i32, %c0_i32_0 : i32, i32
  }
  func.func @transform_7(%arg0: i32, %arg1: i32) -> (i32, i32, i32) {
    %c0_i32 = arith.constant 0 : i32
    %c0_i32_0 = arith.constant 0 : i32
    return %arg0, %c0_i32, %arg1 : i32, i32, i32
  }
  func.func @transform_8(%arg0: i32, %arg1: i32) -> (i32, i32, i32, i32) {
    %c0_i32 = arith.constant 0 : i32
    %c0_i32_0 = arith.constant 0 : i32
    %c0_i32_1 = arith.constant 0 : i32
    return %arg0, %arg1, %c0_i32, %c0_i32_0 : i32, i32, i32, i32
  }
}

module attributes {stable_mosaic.version = 11 : i64} {
  func.func @_bn_relu_kernel(%arg0: i32, %arg1: i32, %arg2: memref<1x8x16xf32, #tpu.memory_space<vmem>>, %arg3: memref<8x1xf32, #tpu.memory_space<vmem>>, %arg4: memref<8x1xf32, #tpu.memory_space<vmem>>, %arg5: memref<1x8x16xf32, #tpu.memory_space<vmem>>) attributes {dimension_semantics = [#tpu.dimension_semantics<parallel>, #tpu.dimension_semantics<parallel>], iteration_bounds = array<i64: 2, 1>, scalar_prefetch = 0 : i64, scratch_operands = 0 : i64, tpu.core_type = #tpu.core_type<tc>, window_params = [{transform_indices = @transform_0, window_bounds = array<i64: 1, 8, 16>}, {pipeline_mode = #tpu.pipeline_mode<synchronous>, transform_indices = @transform_1, window_bounds = array<i64: 8, 1>}, {pipeline_mode = #tpu.pipeline_mode<synchronous>, transform_indices = @transform_2, window_bounds = array<i64: 8, 1>}, {transform_indices = @transform_3, window_bounds = array<i64: 1, 8, 16>}]} {
    %c0 = arith.constant 0 : index
    %c0_0 = arith.constant 0 : index
    %c0_1 = arith.constant 0 : index
    %0 = vector.load %arg2[%c0, %c0_0, %c0_1] : memref<1x8x16xf32, #tpu.memory_space<vmem>>, vector<1x8x16xf32>
    %1 = vector.shape_cast %0 : vector<1x8x16xf32> to vector<8x16xf32>
    %c0_2 = arith.constant 0 : index
    %c0_3 = arith.constant 0 : index
    %2 = vector.load %arg3[%c0_2, %c0_3] : memref<8x1xf32, #tpu.memory_space<vmem>>, vector<8x1xf32>
    %3 = vector.broadcast %2 : vector<8x1xf32> to vector<8x16xf32>
    %4 = arith.mulf %1, %3 : vector<8x16xf32>
    %c0_4 = arith.constant 0 : index
    %c0_5 = arith.constant 0 : index
    %5 = vector.load %arg4[%c0_4, %c0_5] : memref<8x1xf32, #tpu.memory_space<vmem>>, vector<8x1xf32>
    %6 = vector.broadcast %5 : vector<8x1xf32> to vector<8x16xf32>
    %7 = arith.addf %4, %6 : vector<8x16xf32>
    %cst = arith.constant 0.000000e+00 : f32
    %8 = vector.broadcast %cst : f32 to vector<8x16xf32>
    %9 = arith.maximumf %7, %8 : vector<8x16xf32>
    %c0_6 = arith.constant 0 : index
    %c0_7 = arith.constant 0 : index
    %c0_8 = arith.constant 0 : index
    %10 = vector.load %arg5[%c0_6, %c0_7, %c0_8] : memref<1x8x16xf32, #tpu.memory_space<vmem>>, vector<1x8x16xf32>
    %11 = vector.shape_cast %10 : vector<1x8x16xf32> to vector<8x16xf32>
    %12 = vector.shape_cast %9 : vector<8x16xf32> to vector<1x8x16xf32>
    tpu.vector_store %arg5[%c0_6, %c0_7, %c0_8], %12 {strides = array<i32>} : memref<1x8x16xf32, #tpu.memory_space<vmem>>, vector<1x8x16xf32>,
    return
  }
  func.func @transform_0(%arg0: i32, %arg1: i32) -> (i32, i32, i32) {
    %c0_i32 = arith.constant 0 : i32
    %c0_i32_0 = arith.constant 0 : i32
    return %arg0, %c0_i32, %arg1 : i32, i32, i32
  }
  func.func @transform_1(%arg0: i32, %arg1: i32) -> (i32, i32) {
    %c0_i32 = arith.constant 0 : i32
    %c0_i32_0 = arith.constant 0 : i32
    %c0_i32_1 = arith.constant 0 : i32
    return %c0_i32, %c0_i32_0 : i32, i32
  }
  func.func @transform_2(%arg0: i32, %arg1: i32) -> (i32, i32) {
    %c0_i32 = arith.constant 0 : i32
    %c0_i32_0 = arith.constant 0 : i32
    %c0_i32_1 = arith.constant 0 : i32
    return %c0_i32, %c0_i32_0 : i32, i32
  }
  func.func @transform_3(%arg0: i32, %arg1: i32) -> (i32, i32, i32) {
    %c0_i32 = arith.constant 0 : i32
    %c0_i32_0 = arith.constant 0 : i32
    return %arg0, %c0_i32, %arg1 : i32, i32, i32
  }
}

</mosaic_0001>

<bundles_post_ra>
// kernel: unet1d_block_forward.5
= control target key start
LH: loop header
LB: loop body
LE: loop exit
PB: predicated region body
PF: predicated region fallthrough
CT: control target
= control target key end

     0   :  { %8 = vsyncpa [#allocation3], 0  ;;  %s583_s0 = inlined_call_operand.vmem [shape: f32[2,8,16], index: 0, kind: input, shape index: {}]   ;;  %s584_s1 = inlined_call_operand.vmem [shape: f32[8,1], index: 1, kind: input, shape index: {}]   ;;  %s585_s2 = inlined_call_operand.vmem [shape: f32[8,1], index: 2, kind: input, shape index: {}]   ;;  %s586_s3 = inlined_call_operand.hbm [shape: f32[2,8,16], index: 3, kind: output, shape index: {}]  }
   0x1   :  { %10 = vsyncpa [#allocation3 + $0x1], 0  ;;  %s465_s12 = smov 0   ;;  %s467_s13 = smov 0  }
   0x2   :  { %s469_s14 = smov 0   ;;  %s471_s15 = smov 0  }
   0x3   :  { %s473_s16 = smov 0   ;;  %s475_s17 = smov 0  }
   0x4 LB: > { %s295_s18 = sadd.s32 4294967295, %s441_s17   ;;  %s296_s19 = sadd.s32 4294967294, %s441_s17   ;;  %s441_s17 = sphi %s475_s17, %s16_s17   ;;  %s437_s16 = sphi %s473_s16, %s593_s16   ;;  %s433_s15 = sphi %s471_s15, %s592_s15   ;;  %s429_s14 = sphi %s469_s14, %s591_s14   ;;  %s425_s13 = sphi %s467_s13, %s590_s13   ;;  %s421_s12 = sphi %s465_s12, %s589_s12  }
   0x5   : > { %s28_s20 = sadd.s32 1, %s437_s16  ;;  %s107_s21 = sadd.s32 1, %s429_s14 }
   0x6   : > { %p30_p0 = scmp.ge.s32.totalorder %s28_s20, 2  ;;  %p117_p1 = scmp.ne.s32.totalorder %s429_s14, %s425_s13 }
   0x7   : > { %p118_p2 = scmp.eq.s32.totalorder %s295_s18, 1  ;;  %p123_p3 = scmp.ne.s32.totalorder %s425_s13, %s421_s12 }
   0x8   : > { %s595_s20 = smov (%p30_p0, %s28_s20), 0  ;;  %p124_p5 = scmp.eq.s32.totalorder %s296_s19, 1 }
   0x9   : > { %p505_p4 = por %p118_p2, %p117_p1  ;;  %s102_s23 = ssub.s32 %s437_s16, %s595_s20 }
   0xa   : > { %p299_p6 = scmp.ge.s32.totalorder %s441_s17, 1  ;;  %p105_p7 = scmp.eq.s32.totalorder %s102_s23, 0 }
   0xb   : > { %p512_p8 = por %p124_p5, %p123_p3  ;;  %p158_p9 = scmp.lt.s32.totalorder %s441_s17, 3 }
   0xc   : > { %s518_s25 = scalar_select %p105_p7, %s429_s14, %s107_s21  }
   0xd   : > { %p159_p10 = pnand %p299_p6, %p158_p9 }
   0xe   : > { %v192_v0 = vld [vmem:[%s584_s1] sm:$0xff] (!%p159_p10)  ;;  %v443_v1 = vmov (!%p159_p10), 0   ;;  %p184_p11 = scmp.lt.s32.totalorder (!%p159_p10), %s433_s15, 1  ;;  %s181_s5 = sand.u32 (!%p159_p10), 1, %s425_s13   ;;  %vm207_vm0 = vcmask (!%p159_p10), 130048  }
   0xf   : > { %162 = sbr.rel (%p159_p10) target bundleno = 166 (0xa6), region = 32  ;;  %362 = vset.pattern.permute.xlu0 (!%p159_p10), %v443_v1  ;;  %v199_v2 = vld [vmem:[%s585_s2] sm:$0xff] (!%p159_p10)  ;;  %s300_s9 = sshll.u32 (!%p159_p10), %s181_s5, 3 }
  0x10   : > { %195 = vperm.xlu0 (!%p159_p10), %362, %v192_v0   ;;  %s303_s10 = sshll.u32 (!%p159_p10), %s433_s15, 7  ;;  %s183_s11 = scalar_lea.vmem (!%p159_p10), [#allocation2], %s300_s9 }
  0x11   : > { %s224_s18 = sshll.u32 (!%p159_p10), %s183_s11, 4  ;;  %s536_s23 = scalar_lea.hbm (!%p159_p10), %s586_s3, %s303_s10  ;;  %s538_s18 = int_to_ptr.vmem [resolvable:$true] %s224_s18 }
  0x12   : > { %s210_s26 = scalar_lea.sflag (!%p159_p10), [#allocation3], %s181_s5  ;;  %s363_s27 = scalar_lea.vmem (!%p159_p10), %s538_s18, 128 }
  0x13   : > { %p364_p12 = scmp.ne.s32.totalorder (!%p159_p10), %s538_s18, %s363_s27 }
  0x14   : > { %202 = vperm.xlu0 (!%p159_p10), %362, %v199_v2  }
  0x15   : > { %p365_p13 = pnand (!%p159_p10), %p364_p12, %p505_p4 }
  0x16   : > { %s185_s30 = scalar_select %p184_p11, %s433_s15, 1 }
  0x17   : > { %p366_p0 = pneg %p365_p13  ;;  %s444_s15 = smov [#allocation2]  }
  0x18   : > { %s301_s4 = sshll.u32 %s185_s30, 3  ;;  %s367_s28 = sshll.u32 %s444_s15, 4  ;;  %s368_s28 = int_to_ptr.vmem [resolvable:$false] %s367_s28 }
  0x19   : > { %s190_s8 = scalar_lea.vmem %s583_s0, %s301_s4  ;;  %s369_s29 = scalar_lea.vmem %s368_s28, 256 }
  0x1a   : > { %v191_v4 = vld [vmem:[%s190_s8] sm:$0xff]  ;;  %p370_p1 = scmp.lt.s32.totalorder %s538_s18, %s368_s28  ;;  %p371_p2 = scmp.lt.s32.totalorder %s369_s29, %s363_s27 }
  0x1c   : > { %p372_p3 = por %p371_p2, %p370_p1 }
  0x1e   : > { %p373_p5 = pnand %p372_p3, %p366_p0 }
  0x8f   : > { %v196_v3 = vpop.permute.xlu0 %195 }
  0x90   : > { %v198_v5 = vmul.f32 %v196_v3, %v191_v4 }
  0x93   : > { %v203_v6 = vpop.permute.xlu0 %202 }
  0x94   : > { %v205_v7 = vadd.f32 %v203_v6, %v198_v5 }
  0x96   : > { %v206_v8 = vmax.f32 %v205_v7, 0.0 }
  0x98   : > { %208 = vst.msk [vmem:[%s183_s11] sm:$0xff] %vm207_vm0, %v206_v8 }
  0x99   : > { %376 = shalt.err (!%p373_p5)
}
  0x9a   : > { %s377_s30 = scalar_lea.hbm %s536_s23, 128  ;;  %s381_s6 = scalar_lea.hbm %s586_s3, 256 }
  0x9b   : > { %p378_p6 = scmp.ne.s32.totalorder %s536_s23, %s377_s30  ;;  %p382_p10 = scmp.lt.u32.totalorder %s536_s23, %s586_s3 }
  0x9c   : > { %p383_p11 = scmp.lt.u32.totalorder %s381_s6, %s377_s30  ;;  %p385_p13 = scmp.lt.u32.totalorder %s377_s30, %s536_s23 }
  0x9d   : > { %p379_p7 = pnand %p378_p6, %p505_p4 }
  0x9e   : > { %p384_p12 = por %p383_p11, %p382_p10 }
  0x9f   : > { %p380_p9 = pneg %p379_p7 }
  0xa0   : > { %p386_p0 = por %p385_p13, %p384_p12 }
  0xa2   : > { %p387_p1 = pnand %p386_p0, %p380_p9 }
  0xa4   : > { %390 = shalt.err (!%p387_p1)
}
  0xa5   : > { %306 = dma.vmem_to_hbm [thread:$0]  (%p505_p4), %s538_s18, 128, %s536_s23, %s210_s26  }
  0xa6 PF: > { %p312_p2 = scmp.ge.s32.totalorder %s441_s17, 2  ;;  %s236_s9 = sand.u32 1, %s421_s12  }
  0xa7   : > { %s237_s10 = scalar_lea.sflag [#allocation3], %s236_s9 }
  0xa8   : > { %p309_p3 = pnand %p312_p2, %p512_p8 }
  0xaa   : > { %416 = dma.done.wait (!%p309_p3), %s237_s10, 128  }
  0xab   : > { %418 = vsyncadd (!%p309_p3), %s237_s10, 4294967168  ;;  %s16_s17 = sadd.s32 1, %s441_s17   ;;  %s589_s12 = smov %s425_s13 }
  0xac   : > { %p13_p5 = scmp.ge.s32.totalorder %s16_s17, 4   ;;  %s590_s13 = smov %s429_s14 }
  0xad   : > { %s591_s14 = smov %s518_s25  ;;  %s592_s15 = smov %s437_s16 }
  0xae   : > { %s593_s16 = smov %s595_s20  ;;  %15 = sbr.rel (!%p13_p5) target bundleno = 4 (0x4), region = 67 }
  0xb5   :  { %242 = vsyncpa [#allocation3], 1 }
  0xb6   :  { %244 = vsyncpa [#allocation3 + $0x1], 1 }

// kernel: unet1d_block_forward.3
= control target key start
LH: loop header
LB: loop body
LE: loop exit
PB: predicated region body
PF: predicated region fallthrough
CT: control target
= control target key end

     0   :  { %s2266_s27 = smov 0   ;;  %s2268_s28 = smov 0   ;;  %s2392_s0 = inlined_call_operand.vmem [shape: f32[2,4,16], index: 0, kind: input, shape index: {}, may-alias: {0,1,2}]   ;;  %s2393_s1 = inlined_call_operand.vmem [shape: f32[2,4,16], index: 1, kind: input, shape index: {}, may-alias: {0,1,2}]   ;;  %s2394_s2 = inlined_call_operand.vmem [shape: f32[2,4,16], index: 2, kind: input, shape index: {}, may-alias: {0,1,2}]   ;;  %s2395_s3 = inlined_call_operand.vmem [shape: f32[3,8,4], index: 3, kind: input, shape index: {}]   ;;  %s2396_s4 = inlined_call_operand.vmem [shape: f32[8,1], index: 4, kind: input, shape index: {}]   ;;  %s2397_s5 = inlined_call_operand.vmem [shape: f32[4,1], index: 5, kind: input, shape index: {}]   ;;  %s2398_s6 = inlined_call_operand.vmem [shape: f32[4,1], index: 6, kind: input, shape index: {}]   ;;  %s2399_s7 = inlined_call_operand.vmem [shape: f32[2,8,16], index: 7, kind: output, shape index: {0}]   ;;  %s2400_s8 = inlined_call_operand.vmem [shape: f32[2,1,8,2], index: 8, kind: output, shape index: {1}]  }
   0x1   :  { %s2270_s29 = smov 0  }
   0x2 LB: > { %s31_s5 = sadd.s32 1, %s2208_s28  ;;  %p2020_p0 = scmp.ge.s32.totalorder %s2212_s29, 1  ;;  %s2212_s29 = sphi %s2270_s29, %s19_s29   ;;  %s2208_s28 = sphi %s2268_s28, %s2402_s28   ;;  %s2204_s27 = sphi %s2266_s27, %s2401_s27  }
   0x3   : > { %p33_p1 = scmp.ge.s32.totalorder %s31_s5, 2  ;;  %p337_p2 = scmp.lt.s32.totalorder %s2212_s29, 3 }
   0x5   : > { %s2404_s5 = smov (%p33_p1, %s31_s5), 0  ;;  %p338_p3 = pnand %p2020_p0, %p337_p2 }
   0x6   : > { %p402_p4 = scmp.lt.s32.totalorder (!%p338_p3), %s2204_s27, 1  ;;  %vm450_vm0 = vcmask (!%p338_p3), 125952   ;;  %s2214_s17 = smov (!%p338_p3), 112   ;;  %v2215_v5 = vmov (!%p338_p3), 0.0   ;;  %vm2216_vm1 = vmmov (!%p338_p3), 0   ;;  %v2026_v6 = vld [vmem:[%s2395_s3 + $0x8] sm:$0xff] (!%p338_p3) }
   0x7   : > { %341 = sbr.rel (%p338_p3) target bundleno = 664 (0x298), region = 48  ;;  %2066 = vmatprep.subr.mxu0 (!%p338_p3), %v2215_v5  ;;  %2071 = vmatprep.subr.mxu1 (!%p338_p3), %v2215_v5  ;;  %s2217_s18 = smov (!%p338_p3), 16   ;;  %vm481_vm2 = vcmask (!%p338_p3), 31744   ;;  %vm462_vm3 = vcmask (!%p338_p3), 1044472   ;;  %vm474_vm4 = vcmask (!%p338_p3), 134272   ;;  %vm485_vm5 = vcmask (!%p338_p3), 1043456  }
   0x8   : > { %2068 = vmatprep.mubr.msk.f32.mxu0 (!%p338_p3), %vm2216_vm1, %v2215_v5  ;;  %2073 = vmatprep.mubr.msk.f32.mxu1 (!%p338_p3), %vm2216_vm1, %v2215_v5  ;;  %v483_v7 = vsel (!%p338_p3), %vm481_vm2, %v2026_v6, 0  ;;  %s2218_s21 = smov (!%p338_p3), 127   ;;  %s2219_s22 = smov (!%p338_p3), 1   ;;  %v1852_v25 = vld [vmem:[%s2396_s4] sm:$0xff] (!%p338_p3)  ;;  %v2220_v26 = vmov (!%p338_p3), 0   ;;  %v2027_v31 = vld [vmem:[%s2395_s3 + $0x10] sm:$0xff] (!%p338_p3) }
   0x9   : > { %v555_v8 = vand.u32 (!%p338_p3), 4294901760, %v483_v7  ;;  %2187 = vset.pattern.permute.xlu1 (!%p338_p3), %v2220_v26  ;;  %2188 = vset.pattern.permute.xlu0 (!%p338_p3), %v2220_v26  ;;  %v477_v27 = vld [vmem:[%s2395_s3] sm:$0xff] (!%p338_p3)  ;;  %v1401_v34 = vsel (!%p338_p3), %vm481_vm2, %v2027_v31, 0  ;;  %vm941_vm6 = vcmask (!%p338_p3), 7168   ;;  %vm1859_vm7 = vcmask (!%p338_p3), 130048  }
   0xa   : > { %v944_v28 = vsel (!%p338_p3), %vm481_vm2, %v477_v27, 0  ;;  %v2336_v37 = vand.u32 (!%p338_p3), 4294901760, %v1401_v34  ;;  %vm1869_vm8 = vcmask (!%p338_p3), 15368  }
   0xb   : > { %v556_v10 = vsub.f32 (!%p338_p3), %v483_v7, %v555_v8  ;;  %v1014_v29 = vand.u32 (!%p338_p3), 4294901760, %v944_v28 }
   0xc   : > { %v1472_v44 = vsub.f32 (!%p338_p3), %v1401_v34, %v2336_v37 }
   0xd   : > { %v557_v12 = vand.u32 (!%p338_p3), 4294901760, %v556_v10  ;;  %v1015_v30 = vsub.f32 (!%p338_p3), %v944_v28, %v1014_v29 }
   0xe   : > { %s2406_s27 = smov (!%p402_p4, %s2204_s27), 1  ;;  %v1473_v48 = vand.u32 4294901760, %v1472_v44 }
   0xf   : > { %s2021_s6 = sshll.u32 %s2406_s27, 2  ;;  %v558_v13 = vsub.f32 %v556_v10, %v557_v12  ;;  %v1016_v32 = vand.u32 4294901760, %v1015_v30  ;;  %s2024_s9 = sshll.u32 %s2406_s27, 3 }
  0x10   : > { %s418_s10 = scalar_lea.vmem %s2393_s1, %s2021_s6  ;;  %s431_s13 = scalar_lea.vmem %s2394_s2, %s2021_s6  ;;  %v1474_v52 = vsub.f32 %v1472_v44, %v1473_v48 }
  0x11   : > { %v455_v0 = vld [vmem:[%s418_s10] sm:$0xf]  ;;  %s408_s16 = scalar_lea.vmem %s2392_s0, %s2021_s6  ;;  %v559_v18 = vand.u32 4294901760, %v558_v13  ;;  %v1017_v35 = vsub.f32 %v1015_v30, %v1016_v32  ;;  %s441_s12 = scalar_lea.vmem %s2399_s7, %s2024_s9 }
  0x12   : > { %v467_v1 = vld [vmem:[%s431_s13] sm:$0xf]  ;;  %v457_v2 = vmul.f32 0.0, %v455_v0  ;;  %v1475_v54 = vand.u32 4294901760, %v1474_v52  ;;  %s448_s15 = scalar_lea.vmem %s2400_s8, %s2024_s9 }
  0x13   : > { %v449_v3 = vld [vmem:[%s408_s16] sm:$0xf]  ;;  %v469_v4 = vmul.f32 0.0, %v467_v1  ;;  %v1018_v42 = vand.u32 4294901760, %v1017_v35 }
  0x14   : > { %451 = vst.msk [vmem:[#allocation2 + $0x4] sm:$0xf] %vm450_vm0, %v449_v3  ;;  %459 = vrot.lane.b32.xlu0 %v457_v2, %s2214_s17 }
  0x18   : > { %471 = vrot.lane.b32.xlu0 %v469_v4, %s2217_s18 }
  0x86   : > { %v460_v9 = vpop.permute.xlu0 %459 }
  0x87   : > { %463 = vst.msk [vmem:[#allocation2] sm:$0xf] %vm462_vm3, %v460_v9 }
  0x8a   : > { %v472_v11 = vpop.permute.xlu0 %471 }
  0x8b   : > { %475 = vst.msk [vmem:[#allocation2 + $0x4] sm:$0xf] %vm474_vm4, %v472_v11 }
  0x92   : > { %v1394_v14 = vld [vmem:[#allocation2 + $0x4] sm:$0xf] }
  0x93   : > { %v476_v15 = vld [vmem:[#allocation2] sm:$0xff]  ;;  %1398 = vrot.lane.b32.xlu0 %v1394_v14, %s2218_s21 }
  0x94   : > { %v478_v16 = vld [vmem:[#allocation2 + $0x4] sm:$0xf]  ;;  %937 = vrot.lane.b32.xlu1 %v476_v15, %s2219_s22  ;;  %v936_v20 = vcombine.high %v476_v15, %v476_v15 }
  0x95   : > { %v487_v17 = vsel %vm485_vm5, %v478_v16, 0 }
  0x96   : > { %v490_v19 = vand.u32 4294901760, %v487_v17 }
  0x98   : > { %2067 = vmatpush3.msra.mxu0 %v490_v19  ;;  %v567_v21 = vsub.f32 %v487_v17, %v490_v19  ;;  %939 = vrot.lane.b32.xlu1 %v936_v20, %s2219_s22 }
  0x99   : > { %2069 = vmatmul.mubr.f32.vlgmr.msra.gmra.mrb[0].mxu0 %v559_v18  ;;  %2076 = vmatprep.subr.mxu0 %v2215_v5 }
  0x9a   : > { %2077 = vmatpush3.msra.mxu0 %v567_v21  ;;  %v568_v22 = vand.u32 4294901760, %v567_v21  ;;  %2078 = vmatprep.mubr.msk.f32.mxu0 %vm2216_vm1, %v2215_v5 }
  0x9b   : > { %2086 = vmatprep.subr.mxu0 %v2215_v5 }
  0x9c   : > { %v569_v23 = vsub.f32 %v567_v21, %v568_v22  ;;  %1855 = vperm.xlu1 %2187, %v1852_v25  }
  0x9d   : > { %2079 = vmatmul.mubr.f32.vlgmr.msra.gmra.mrb[2].mxu0 %v556_v10 }
  0x9e   : > { %2087 = vmatpush3.msra.mxu0 %v568_v22  ;;  %v570_v24 = vand.u32 4294901760, %v569_v23  ;;  %2088 = vmatprep.mubr.msk.f32.mxu0 %vm2216_vm1, %v2215_v5 }
  0x9f   : > { %2096 = vmatprep.subr.mxu0 %v2215_v5 }
  0xa0   : > { %2072 = vmatpush3.msra.mxu1 %v570_v24 }
  0xa1   : > { %2074 = vmatmul.mubr.f32.vlgmr.msra.gmra.mrb[0].mxu1 %v555_v8  ;;  %2081 = vmatprep.subr.mxu1 %v2215_v5 }
  0xa2   : > { %2082 = vmatpush3.msra.mxu1 %v490_v19  ;;  %2083 = vmatprep.mubr.msk.f32.mxu1 %vm2216_vm1, %v2215_v5 }
  0xa3   : > { %2091 = vmatprep.subr.mxu1 %v2215_v5  ;;  %2089 = vmatmul.mubr.f32.vlgmr.msra.gmra.mrb[4].mxu0 %v555_v8 }
  0xa4   : > { %2098 = vmatprep.mubr.msk.f32.mxu0 %vm2216_vm1, %v2215_v5 }
  0xa5   : > { %2084 = vmatmul.mubr.f32.vlgmr.msra.gmra.mrb[2].mxu1 %v557_v12 }
  0xa6   : > { %2092 = vmatpush3.msra.mxu1 %v490_v19  ;;  %2093 = vmatprep.mubr.msk.f32.mxu1 %vm2216_vm1, %v2215_v5 }
  0xa7   : > { %2101 = vmatprep.subr.mxu1 %v2215_v5 }
  0xa9   : > { %2094 = vmatmul.mubr.f32.vlgmr.msra.gmra.mrb[4].mxu1 %v555_v8 }
  0xaa   : > { %2103 = vmatprep.mubr.msk.f32.mxu1 %vm2216_vm1, %v2215_v5 }
 0x105   : > { %v1399_v36 = vpop.permute.xlu0 %1398 }
 0x106   : > { %v938_v33 = vpop.permute.xlu1 %937  ;;  %v1403_v40 = vsel %vm485_vm5, %v1399_v36, 0 }
 0x107   : > { %v1406_v45 = vand.u32 4294901760, %v1403_v40 }
 0x109   : > { %v1483_v49 = vsub.f32 %v1403_v40, %v1406_v45 }
 0x10a   : > { %v940_v38 = vpop.permute.xlu1 %939 }
 0x10b   : > { %v942_v39 = vsel %vm941_vm6, %v938_v33, %v940_v38  ;;  %v1484_v53 = vand.u32 4294901760, %v1483_v49 }
 0x10c   : > { %v946_v41 = vsel %vm485_vm5, %v942_v39, 0 }
 0x10d   : > { %v949_v43 = vand.u32 4294901760, %v946_v41  ;;  %v1485_v55 = vsub.f32 %v1483_v49, %v1484_v53 }
 0x10f   : > { %v1026_v46 = vsub.f32 %v946_v41, %v949_v43  ;;  %2097 = vmatpush3.msra.mxu0 %v949_v43  ;;  %v1486_v56 = vand.u32 4294901760, %v1485_v55 }
 0x110   : > { %2099 = vmatmul.mubr.f32.vlgmr.msra.gmra.mrb[6].mxu0 %v1018_v42  ;;  %2106 = vmatprep.subr.mxu0 %v2215_v5 }
 0x111   : > { %2107 = vmatpush3.msra.mxu0 %v1026_v46  ;;  %2108 = vmatprep.mubr.msk.f32.mxu0 %vm2216_vm1, %v2215_v5  ;;  %v1027_v47 = vand.u32 4294901760, %v1026_v46 }
 0x112   : > { %2116 = vmatprep.subr.mxu0 %v2215_v5 }
 0x113   : > { %v1028_v50 = vsub.f32 %v1026_v46, %v1027_v47 }
 0x114   : > { %2109 = vmatmul.mubr.f32.vlgmr.msra.gmra.mrb[8].mxu0 %v1015_v30 }
 0x115   : > { %2117 = vmatpush3.msra.mxu0 %v1027_v47  ;;  %v1029_v51 = vand.u32 4294901760, %v1028_v50  ;;  %2118 = vmatprep.mubr.msk.f32.mxu0 %vm2216_vm1, %v2215_v5 }
 0x116   : > { %2126 = vmatprep.subr.mxu0 %v2215_v5 }
 0x117   : > { %2102 = vmatpush3.msra.mxu1 %v1029_v51 }
 0x118   : > { %2104 = vmatmul.mubr.f32.vlgmr.msra.gmra.mrb[6].mxu1 %v1014_v29  ;;  %2111 = vmatprep.subr.mxu1 %v2215_v5 }
 0x119   : > { %2119 = vmatmul.mubr.f32.vlgmr.msra.gmra.mrb[10].mxu0 %v1014_v29  ;;  %2112 = vmatpush3.msra.mxu1 %v949_v43 }
 0x11a   : > { %2127 = vmatpush3.msra.mxu0 %v1406_v45  ;;  %2113 = vmatprep.mubr.msk.f32.mxu1 %vm2216_vm1, %v2215_v5 }
 0x11b   : > { %2121 = vmatprep.subr.mxu1 %v2215_v5  ;;  %2128 = vmatprep.mubr.msk.f32.mxu0 %vm2216_vm1, %v2215_v5 }
 0x11c   : > { %2136 = vmatprep.subr.mxu0 %v2215_v5  ;;  %2114 = vmatmul.mubr.f32.vlgmr.msra.gmra.mrb[8].mxu1 %v1016_v32 }
 0x11d   : > { %2122 = vmatpush3.msra.mxu1 %v949_v43  ;;  %2129 = vmatmul.mubr.f32.vlgmr.msra.gmra.mrb[12].mxu0 %v1475_v54 }
 0x11e   : > { %2137 = vmatpush3.msra.mxu0 %v1483_v49  ;;  %2123 = vmatprep.mubr.msk.f32.mxu1 %vm2216_vm1, %v2215_v5 }
 0x11f   : > { %2131 = vmatprep.subr.mxu1 %v2215_v5  ;;  %2138 = vmatprep.mubr.msk.f32.mxu0 %vm2216_vm1, %v2215_v5 }
 0x120   : > { %2146 = vmatprep.subr.mxu0 %v2215_v5  ;;  %2124 = vmatmul.mubr.f32.vlgmr.msra.gmra.mrb[10].mxu1 %v1014_v29 }
 0x121   : > { %2132 = vmatpush3.msra.mxu1 %v1486_v56  ;;  %2139 = vmatmul.mubr.f32.vlgmr.msra.gmra.mrb[14].mxu0 %v1472_v44 }
 0x122   : > { %2147 = vmatpush3.msra.mxu0 %v1484_v53  ;;  %2133 = vmatprep.mubr.msk.f32.mxu1 %vm2216_vm1, %v2215_v5 }
 0x123   : > { %2141 = vmatprep.subr.mxu1 %v2215_v5  ;;  %2148 = vmatprep.mubr.msk.f32.mxu0 %vm2216_vm1, %v2215_v5 }
 0x124   : > { %2134 = vmatmul.mubr.f32.vlgmr.msra.gmra.mrb[12].mxu1 %v2336_v37 }
 0x125   : > { %2142 = vmatpush3.msra.mxu1 %v1406_v45  ;;  %2143 = vmatprep.mubr.msk.f32.mxu1 %vm2216_vm1, %v2215_v5 }
 0x126   : > { %2151 = vmatprep.subr.mxu1 %v2215_v5  ;;  %2149 = vmatmul.mubr.f32.vlgmr.msra.gmra.mrb[16].mxu0 %v2336_v37 }
 0x128   : > { %2144 = vmatmul.mubr.f32.vlgmr.msra.gmra.mrb[14].mxu1 %v1473_v48 }
 0x129   : > { %2152 = vmatpush3.msra.mxu1 %v1406_v45  ;;  %2153 = vmatprep.mubr.msk.f32.mxu1 %vm2216_vm1, %v2215_v5  ;;  %v1856_v45 = vpop.permute.xlu1 %1855 }
 0x12c   : > { %2154 = vmatmul.mubr.f32.vlgmr.msra.gmra.mrb[16].mxu1 %v2336_v37 }
 0x16c   : > { %v561_v57 = vpop.f32.mrb[0].mxu0 }
 0x16d   : > { %v2070_v58 = vpop.f32.mrb[1].mxu0 }
 0x170   : > { %v711_v59 = vpop.f32.mrb[2].mxu0 }
 0x171   : > { %v2080_v60 = vpop.f32.mrb[3].mxu0 }
 0x174   : > { %v637_v61 = vpop.f32.mrb[0].mxu1 }
 0x175   : > { %v638_v62 = vadd.f32 %v637_v61, %v561_v57  ;;  %v2075_v63 = vpop.f32.mrb[1].mxu1 }
 0x176   : > { %v859_v0 = vpop.f32.mrb[4].mxu0 }
 0x177   : > { %v712_v1 = vadd.f32 %v711_v59, %v638_v62  ;;  %v2090_v2 = vpop.f32.mrb[5].mxu0 }
 0x178   : > { %v785_v3 = vpop.f32.mrb[2].mxu1 }
 0x179   : > { %v786_v4 = vadd.f32 %v785_v3, %v712_v1  ;;  %v2085_v6 = vpop.f32.mrb[3].mxu1 }
 0x17b   : > { %v860_v7 = vadd.f32 %v859_v0, %v786_v4 }
 0x17c   : > { %v931_v8 = vpop.f32.mrb[4].mxu1 }
 0x17d   : > { %v932_v9 = vadd.f32 %v931_v8, %v860_v7  ;;  %v2095_v10 = vpop.f32.mrb[5].mxu1 }
 0x1e3   : > { %v1020_v5 = vpop.f32.mrb[6].mxu0 }
 0x1e4   : > { %v1021_v11 = vadd.f32 %v1020_v5, %v932_v9  ;;  %v2100_v12 = vpop.f32.mrb[7].mxu0 }
 0x1e7   : > { %v1170_v13 = vpop.f32.mrb[8].mxu0 }
 0x1e8   : > { %v2110_v14 = vpop.f32.mrb[9].mxu0 }
 0x1eb   : > { %v1096_v15 = vpop.f32.mrb[6].mxu1 }
 0x1ec   : > { %v1097_v16 = vadd.f32 %v1096_v15, %v1021_v11  ;;  %v2105_v17 = vpop.f32.mrb[7].mxu1  ;;  %v1318_v18 = vpop.f32.mrb[10].mxu0 }
 0x1ed   : > { %v2120_v19 = vpop.f32.mrb[11].mxu0 }
 0x1ee   : > { %v1171_v20 = vadd.f32 %v1170_v13, %v1097_v16 }
 0x1ef   : > { %v1244_v21 = vpop.f32.mrb[8].mxu1 }
 0x1f0   : > { %v1245_v22 = vadd.f32 %v1244_v21, %v1171_v20  ;;  %v2115_v23 = vpop.f32.mrb[9].mxu1  ;;  %v1477_v24 = vpop.f32.mrb[12].mxu0 }
 0x1f1   : > { %v2130_v25 = vpop.f32.mrb[13].mxu0 }
 0x1f2   : > { %v1319_v26 = vadd.f32 %v1318_v18, %v1245_v22 }
 0x1f3   : > { %v1390_v27 = vpop.f32.mrb[10].mxu1 }
 0x1f4   : > { %v1391_v28 = vadd.f32 %v1390_v27, %v1319_v26  ;;  %v2125_v29 = vpop.f32.mrb[11].mxu1  ;;  %v1627_v30 = vpop.f32.mrb[14].mxu0 }
 0x1f5   : > { %v2140_v31 = vpop.f32.mrb[15].mxu0 }
 0x1f7   : > { %v1553_v32 = vpop.f32.mrb[12].mxu1 }
 0x1f8   : > { %v1554_v33 = vadd.f32 %v1553_v32, %v1477_v24  ;;  %v2135_v34 = vpop.f32.mrb[13].mxu1 }
 0x1f9   : > { %v1775_v35 = vpop.f32.mrb[16].mxu0 }
 0x1fa   : > { %v1628_v36 = vadd.f32 %v1627_v30, %v1554_v33  ;;  %v2150_v37 = vpop.f32.mrb[17].mxu0 }
 0x1fb   : > { %v1701_v38 = vpop.f32.mrb[14].mxu1 }
 0x1fc   : > { %v1702_v39 = vadd.f32 %v1701_v38, %v1628_v36  ;;  %v2145_v40 = vpop.f32.mrb[15].mxu1 }
 0x1fe   : > { %v1776_v41 = vadd.f32 %v1775_v35, %v1702_v39 }
 0x1ff   : > { %v1847_v42 = vpop.f32.mrb[16].mxu1 }
 0x200   : > { %v1848_v43 = vadd.f32 %v1847_v42, %v1776_v41  ;;  %v2155_v44 = vpop.f32.mrb[17].mxu1 }
 0x202   : > { %v1851_v46 = vadd.f32 %v1848_v43, %v1391_v28 }
 0x204   : > { %v1858_v47 = vadd.f32 %v1856_v45, %v1851_v46 }
 0x206   : > { %v1861_v48 = vsel %vm1859_vm7, %v1858_v47, 0.0  ;;  %1860 = vst.msk [vmem:[%s441_s12] sm:$0xff] %vm1859_vm7, %v1858_v47  ;;  %v1865_v49 = vmul.f32 %v1858_v47, %v1858_v47 }
 0x207   : > { %1862 = vadd.xlane.f32.xlu0 %v1861_v48 }
 0x208   : > { %v1866_v50 = vsel %vm1859_vm7, %v1865_v49, 0.0 }
 0x209   : > { %1867 = vadd.xlane.f32.xlu1 %v1866_v50 }
 0x294   : > { %v1863_v51 = vpop.xlane.xlu0 %1862 }
 0x295   : > { %1864 = vst.msk [vmem:[%s448_s15] sm:$0xff] %vm941_vm6, %v1863_v51 }
 0x296   : > { %v1868_v52 = vpop.xlane.xlu1 %1867 }
 0x297   : > { %1870 = vst.msk [vmem:[%s448_s15] sm:$0xff] %vm1869_vm8, %v1868_v52 }
 0x298 PF: > { %s19_s29 = sadd.s32 1, %s2212_s29   ;;  %s2401_s27 = smov %s2208_s28 }
 0x299   : > { %p16_p5 = scmp.ge.s32.totalorder %s19_s29, 4   ;;  %s2402_s28 = smov %s2404_s5 }
 0x29b   :  { %18 = sbr.rel (!%p16_p5) target bundleno = 2 (0x2), region = 98 }

// kernel: unet1d_block_forward.4
= control target key start
LH: loop header
LB: loop body
LE: loop exit
PB: predicated region body
PF: predicated region fallthrough
CT: control target
= control target key end

     0   :  { %s2291_s27 = smov 0   ;;  %s2293_s28 = smov 0   ;;  %s2446_s0 = inlined_call_operand.vmem [shape: f32[2,8,16], index: 0, kind: input, shape index: {}, may-alias: {0,1,2}]   ;;  %s2447_s1 = inlined_call_operand.vmem [shape: f32[2,8,16], index: 1, kind: input, shape index: {}, may-alias: {0,1,2}]   ;;  %s2448_s2 = inlined_call_operand.vmem [shape: f32[2,8,16], index: 2, kind: input, shape index: {}, may-alias: {0,1,2}]   ;;  %s2449_s3 = inlined_call_operand.vmem [shape: f32[3,8,8], index: 3, kind: input, shape index: {}]   ;;  %s2450_s4 = inlined_call_operand.vmem [shape: f32[8,1], index: 4, kind: input, shape index: {}]   ;;  %s2451_s5 = inlined_call_operand.vmem [shape: f32[8,1], index: 5, kind: input, shape index: {}]   ;;  %s2452_s6 = inlined_call_operand.vmem [shape: f32[8,1], index: 6, kind: input, shape index: {}]   ;;  %s2453_s7 = inlined_call_operand.vmem [shape: f32[2,8,16], index: 7, kind: output, shape index: {0}]   ;;  %s2454_s8 = inlined_call_operand.vmem [shape: f32[2,1,8,2], index: 8, kind: output, shape index: {1}]  }
   0x1   :  { %s2295_s29 = smov 0  }
   0x2 LB: > { %s31_s30 = sadd.s32 1, %s2232_s28  ;;  %p2044_p0 = scmp.ge.s32.totalorder %s2236_s29, 1  ;;  %s2236_s29 = sphi %s2295_s29, %s19_s29   ;;  %s2232_s28 = sphi %s2293_s28, %s2456_s28   ;;  %s2228_s27 = sphi %s2291_s27, %s2455_s27  }
   0x3   : > { %p33_p1 = scmp.ge.s32.totalorder %s31_s30, 2  ;;  %p337_p2 = scmp.lt.s32.totalorder %s2236_s29, 3 }
   0x5   : > { %s2458_s30 = smov (%p33_p1, %s31_s30), 0  ;;  %p338_p3 = pnand %p2044_p0, %p337_p2 }
   0x6   : > { %v471_v0 = vld [vmem:[%s2451_s5] sm:$0xff] (!%p338_p3)  ;;  %p402_p4 = scmp.lt.s32.totalorder (!%p338_p3), %s2228_s27, 1  ;;  %s2238_s11 = smov (!%p338_p3), 15   ;;  %v2239_v1 = vmov (!%p338_p3), 0   ;;  %v2241_v8 = vmov (!%p338_p3), 0.0   ;;  %vm2242_vm0 = vmmov (!%p338_p3), 0  }
   0x7   : > { %341 = sbr.rel (%p338_p3) target bundleno = 766 (0x2fe), region = 48  ;;  %473 = vrot.lane.b32.xlu0 (!%p338_p3), %v471_v0, %s2238_s11  ;;  %2212 = vset.pattern.permute.xlu1 (!%p338_p3), %v2239_v1  ;;  %v477_v2 = vld [vmem:[%s2452_s6] sm:$0xff] (!%p338_p3)  ;;  %s2240_s18 = smov (!%p338_p3), 16   ;;  %v2050_v16 = vld [vmem:[%s2449_s3 + $0x8] sm:$0xff] (!%p338_p3)  ;;  %vm514_vm1 = vcmask (!%p338_p3), 64512   ;;  %vm465_vm2 = vcmask (!%p338_p3), 130048  }
   0x8   : > { %453 = vperm.xlu1 (!%p338_p3), %2212, %v471_v0   ;;  %2213 = vset.pattern.permute.xlu0 (!%p338_p3), %v2239_v1  ;;  %v516_v18 = vsel (!%p338_p3), %vm514_vm1, %v2050_v16, 0  ;;  %vm507_vm3 = vcmask (!%p338_p3), 138368   ;;  %s2244_s9 = smov (!%p338_p3), 1   ;;  %v1877_v32 = vld [vmem:[%s2450_s4] sm:$0xff] (!%p338_p3)  ;;  %vm490_vm4 = vcmask (!%p338_p3), 1048568   ;;  %s2245_s12 = smov (!%p338_p3), 127  }
   0x9   : > { %2095 = vmatprep.subr.mxu1 (!%p338_p3), %v2241_v8  ;;  %2097 = vmatprep.mubr.msk.f32.mxu1 (!%p338_p3), %vm2242_vm0, %v2241_v8  ;;  %v584_v21 = vand.u32 (!%p338_p3), 4294901760, %v516_v18  ;;  %v511_v39 = vld [vmem:[%s2449_s3] sm:$0xff] (!%p338_p3)  ;;  %v2051_v43 = vld [vmem:[%s2449_s3 + $0x10] sm:$0xff] (!%p338_p3)  ;;  %vm970_vm5 = vcmask (!%p338_p3), 7168   ;;  %vm1893_vm6 = vcmask (!%p338_p3), 15368  }
   0xa   : > { %2090 = vmatprep.subr.mxu0 (!%p338_p3), %v2241_v8  ;;  %2092 = vmatprep.mubr.msk.f32.mxu0 (!%p338_p3), %vm2242_vm0, %v2241_v8  ;;  %v974_v40 = vsel (!%p338_p3), %vm514_vm1, %v511_v39, 0  ;;  %v1428_v45 = vsel (!%p338_p3), %vm514_vm1, %v2051_v43, 0 }
   0xb   : > { %479 = vrot.lane.b32.xlu0 (!%p338_p3), %v477_v2, %s2238_s11  ;;  %v585_v24 = vsub.f32 (!%p338_p3), %v516_v18, %v584_v21  ;;  %v2367_v41 = vand.u32 (!%p338_p3), 4294901760, %v974_v40  ;;  %v2374_v47 = vand.u32 (!%p338_p3), 4294901760, %v1428_v45 }
   0xc   : > { %460 = vperm.xlu1 (!%p338_p3), %2212, %v477_v2  }
   0xd   : > { %v586_v27 = vand.u32 (!%p338_p3), 4294901760, %v585_v24  ;;  %v1043_v42 = vsub.f32 (!%p338_p3), %v974_v40, %v2367_v41  ;;  %v2378_v55 = vsub.f32 (!%p338_p3), %v1428_v45, %v2374_v47 }
   0xe   : > { %s2460_s27 = smov (!%p402_p4, %s2228_s27), 1 }
   0xf   : > { %s2315_s14 = sshll.u32 %s2460_s27, 3  ;;  %s2243_s27 = smov 112   ;;  %v587_v28 = vsub.f32 %v585_v24, %v586_v27  ;;  %v1044_v44 = vand.u32 4294901760, %v1043_v42  ;;  %v1498_v62 = vand.u32 4294901760, %v2378_v55 }
  0x10   : > { %s431_s17 = scalar_lea.vmem %s2448_s2, %s2315_s14  ;;  %s418_s21 = scalar_lea.vmem %s2447_s1, %s2315_s14 }
  0x11   : > { %v495_v3 = vld [vmem:[%s431_s17] sm:$0xff]  ;;  %s408_s24 = scalar_lea.vmem %s2446_s0, %s2315_s14  ;;  %v588_v30 = vand.u32 4294901760, %v587_v28  ;;  %v1045_v46 = vsub.f32 %v1043_v42, %v1044_v44  ;;  %s441_s20 = scalar_lea.vmem %s2453_s7, %s2315_s14 }
  0x12   : > { %v497_v4 = vmul.f32 %v495_v3, %v471_v0  ;;  %v470_v10 = vld [vmem:[%s418_s21] sm:$0xff]  ;;  %s448_s23 = scalar_lea.vmem %s2454_s8, %s2315_s14 }
  0x13   : > { %v449_v17 = vld [vmem:[%s408_s24] sm:$0xff]  ;;  %v1046_v53 = vand.u32 4294901760, %v1045_v46 }
  0x14   : > { %v499_v5 = vadd.f32 %v497_v4, %v477_v2 }
  0x16   : > { %v500_v6 = vmax.f32 %v499_v5, 0.0 }
  0x18   : > { %v502_v7 = vmul.f32 0.0, %v500_v6 }
  0x1a   : > { %504 = vrot.lane.b32.xlu1 %v502_v7, %s2240_s18 }
  0x79   : > { %v474_v9 = vpop.permute.xlu0 %473 }
  0x7a   : > { %v476_v11 = vmul.f32 %v474_v9, %v470_v10  ;;  %v1499_v9 = vsub.f32 %v2378_v55, %v1498_v62 }
  0x7d   : > { %v480_v12 = vpop.permute.xlu0 %479 }
  0x7e   : > { %v482_v13 = vadd.f32 %v480_v12, %v476_v11 }
  0x80   : > { %v483_v14 = vmax.f32 %v482_v13, 0.0 }
  0x82   : > { %v485_v15 = vmul.f32 0.0, %v483_v14 }
  0x84   : > { %487 = vrot.lane.b32.xlu0 %v485_v15, %s2243_s27  ;;  %v1500_v15 = vand.u32 4294901760, %v1499_v9 }
  0x87   : > { %v454_v19 = vpop.permute.xlu1 %453 }
  0x88   : > { %v456_v20 = vmul.f32 %v454_v19, %v449_v17 }
  0x8b   : > { %v461_v22 = vpop.permute.xlu1 %460 }
  0x8c   : > { %v463_v23 = vadd.f32 %v461_v22, %v456_v20 }
  0x8e   : > { %v464_v25 = vmax.f32 %v463_v23, 0.0 }
  0x8f   : > { %v505_v26 = vpop.permute.xlu1 %504 }
  0x90   : > { %466 = vst.msk [vmem:[#allocation2 + $0x8] sm:$0xff] %vm465_vm2, %v464_v25 }
  0x91   : > { %508 = vst.msk [vmem:[#allocation2 + $0x8] sm:$0xff] %vm507_vm3, %v505_v26 }
  0x98   : > { %v510_v29 = vld [vmem:[#allocation2 + $0x8] sm:$0xff] }
  0x99   : > { %968 = vrot.lane.b32.xlu1 %v510_v29, %s2244_s9  ;;  %v519_v31 = vand.u32 4294901760, %v510_v29 }
  0x9b   : > { %v596_v33 = vsub.f32 %v510_v29, %v519_v31  ;;  %2091 = vmatpush3.msra.mxu0 %v519_v31 }
  0x9c   : > { %2093 = vmatmul.mubr.f32.vlgmr.msra.gmra.mrb[0].mxu0 %v588_v30  ;;  %2100 = vmatprep.subr.mxu0 %v2241_v8 }
  0x9d   : > { %1880 = vperm.xlu1 %2212, %v1877_v32   ;;  %v597_v34 = vand.u32 4294901760, %v596_v33  ;;  %2101 = vmatpush3.msra.mxu0 %v596_v33 }
  0x9e   : > { %2102 = vmatprep.mubr.msk.f32.mxu0 %vm2242_vm0, %v2241_v8  ;;  %2110 = vmatprep.subr.mxu0 %v2241_v8 }
  0x9f   : > { %v598_v35 = vsub.f32 %v596_v33, %v597_v34 }
  0xa0   : > { %2103 = vmatmul.mubr.f32.vlgmr.msra.gmra.mrb[2].mxu0 %v585_v24 }
  0xa1   : > { %v599_v36 = vand.u32 4294901760, %v598_v35  ;;  %2111 = vmatpush3.msra.mxu0 %v597_v34  ;;  %2112 = vmatprep.mubr.msk.f32.mxu0 %vm2242_vm0, %v2241_v8 }
  0xa2   : > { %2120 = vmatprep.subr.mxu0 %v2241_v8 }
  0xa3   : > { %2096 = vmatpush3.msra.mxu1 %v599_v36 }
  0xa4   : > { %2098 = vmatmul.mubr.f32.vlgmr.msra.gmra.mrb[0].mxu1 %v584_v21  ;;  %2105 = vmatprep.subr.mxu1 %v2241_v8 }
  0xa5   : > { %2106 = vmatpush3.msra.mxu1 %v519_v31  ;;  %2107 = vmatprep.mubr.msk.f32.mxu1 %vm2242_vm0, %v2241_v8 }
  0xa6   : > { %2115 = vmatprep.subr.mxu1 %v2241_v8  ;;  %2113 = vmatmul.mubr.f32.vlgmr.msra.gmra.mrb[4].mxu0 %v584_v21 }
  0xa7   : > { %2122 = vmatprep.mubr.msk.f32.mxu0 %vm2242_vm0, %v2241_v8 }
  0xa8   : > { %2108 = vmatmul.mubr.f32.vlgmr.msra.gmra.mrb[2].mxu1 %v586_v27 }
  0xa9   : > { %2116 = vmatpush3.msra.mxu1 %v519_v31  ;;  %2117 = vmatprep.mubr.msk.f32.mxu1 %vm2242_vm0, %v2241_v8 }
  0xaa   : > { %2125 = vmatprep.subr.mxu1 %v2241_v8 }
  0xac   : > { %2118 = vmatmul.mubr.f32.vlgmr.msra.gmra.mrb[4].mxu1 %v584_v21 }
  0xad   : > { %2127 = vmatprep.mubr.msk.f32.mxu1 %vm2242_vm0, %v2241_v8 }
  0xf6   : > { %v488_v37 = vpop.permute.xlu0 %487 }
  0xf7   : > { %491 = vst.msk [vmem:[#allocation2] sm:$0xff] %vm490_vm4, %v488_v37 }
  0xfe   : > { %v509_v38 = vld [vmem:[#allocation2] sm:$0xff] }
  0xff   : > { %966 = vrot.lane.b32.xlu0 %v509_v38, %s2244_s9 }
 0x103   : > { %1424 = vrot.lane.b32.xlu0 %v510_v29, %s2245_s12 }
 0x10b   : > { %v969_v50 = vpop.permute.xlu1 %968 }
 0x16f   : > { %v590_v48 = vpop.f32.mrb[0].mxu0 }
 0x170   : > { %v2094_v49 = vpop.f32.mrb[1].mxu0 }
 0x171   : > { %v967_v51 = vpop.permute.xlu0 %966 }
 0x172   : > { %v971_v52 = vsel %vm970_vm5, %v967_v51, %v969_v50 }
 0x173   : > { %v977_v54 = vand.u32 4294901760, %v971_v52  ;;  %v740_v56 = vpop.f32.mrb[2].mxu0 }
 0x174   : > { %v2104_v57 = vpop.f32.mrb[3].mxu0 }
 0x175   : > { %v1054_v58 = vsub.f32 %v971_v52, %v977_v54  ;;  %v1425_v59 = vpop.permute.xlu0 %1424  ;;  %2121 = vmatpush3.msra.mxu0 %v977_v54 }
 0x176   : > { %v2380_v60 = vand.u32 4294901760, %v1425_v59  ;;  %2123 = vmatmul.mubr.f32.vlgmr.msra.gmra.mrb[6].mxu0 %v1046_v53  ;;  %2130 = vmatprep.subr.mxu0 %v2241_v8 }
 0x177   : > { %v1055_v61 = vand.u32 4294901760, %v1054_v58  ;;  %2131 = vmatpush3.msra.mxu0 %v1054_v58  ;;  %2132 = vmatprep.mubr.msk.f32.mxu0 %vm2242_vm0, %v2241_v8  ;;  %v666_v63 = vpop.f32.mrb[0].mxu1 }
 0x178   : > { %2140 = vmatprep.subr.mxu0 %v2241_v8  ;;  %v667_v0 = vadd.f32 %v666_v63, %v590_v48  ;;  %v2099_v1 = vpop.f32.mrb[1].mxu1  ;;  %v1508_v3 = vsub.f32 %v1425_v59, %v2380_v60 }
 0x179   : > { %v1056_v2 = vsub.f32 %v1054_v58, %v1055_v61  ;;  %v888_v4 = vpop.f32.mrb[4].mxu0 }
 0x17a   : > { %2133 = vmatmul.mubr.f32.vlgmr.msra.gmra.mrb[8].mxu0 %v1043_v42  ;;  %v741_v5 = vadd.f32 %v740_v56, %v667_v0  ;;  %v2114_v6 = vpop.f32.mrb[5].mxu0  ;;  %v1509_v13 = vand.u32 4294901760, %v1508_v3  ;;  %v1881_v56 = vpop.permute.xlu1 %1880 }
 0x17b   : > { %2141 = vmatpush3.msra.mxu0 %v1055_v61  ;;  %v1057_v7 = vand.u32 4294901760, %v1056_v2  ;;  %2142 = vmatprep.mubr.msk.f32.mxu0 %vm2242_vm0, %v2241_v8  ;;  %v814_v10 = vpop.f32.mrb[2].mxu1 }
 0x17c   : > { %2150 = vmatprep.subr.mxu0 %v2241_v8  ;;  %v815_v11 = vadd.f32 %v814_v10, %v741_v5  ;;  %v2109_v12 = vpop.f32.mrb[3].mxu1  ;;  %v1510_v19 = vsub.f32 %v1508_v3, %v1509_v13 }
 0x17d   : > { %2126 = vmatpush3.msra.mxu1 %v1057_v7 }
 0x17e   : > { %2128 = vmatmul.mubr.f32.vlgmr.msra.gmra.mrb[6].mxu1 %v2367_v41  ;;  %2135 = vmatprep.subr.mxu1 %v2241_v8  ;;  %v889_v14 = vadd.f32 %v888_v4, %v815_v11  ;;  %v1511_v20 = vand.u32 4294901760, %v1510_v19 }
 0x17f   : > { %2143 = vmatmul.mubr.f32.vlgmr.msra.gmra.mrb[10].mxu0 %v2367_v41  ;;  %2136 = vmatpush3.msra.mxu1 %v977_v54  ;;  %v960_v16 = vpop.f32.mrb[4].mxu1 }
 0x180   : > { %2151 = vmatpush3.msra.mxu0 %v2380_v60  ;;  %2137 = vmatprep.mubr.msk.f32.mxu1 %vm2242_vm0, %v2241_v8  ;;  %v961_v17 = vadd.f32 %v960_v16, %v889_v14  ;;  %v2119_v18 = vpop.f32.mrb[5].mxu1 }
 0x181   : > { %2145 = vmatprep.subr.mxu1 %v2241_v8  ;;  %2152 = vmatprep.mubr.msk.f32.mxu0 %vm2242_vm0, %v2241_v8 }
 0x182   : > { %2160 = vmatprep.subr.mxu0 %v2241_v8  ;;  %2138 = vmatmul.mubr.f32.vlgmr.msra.gmra.mrb[8].mxu1 %v1044_v44 }
 0x183   : > { %2146 = vmatpush3.msra.mxu1 %v977_v54  ;;  %2153 = vmatmul.mubr.f32.vlgmr.msra.gmra.mrb[12].mxu0 %v1500_v15 }
 0x184   : > { %2161 = vmatpush3.msra.mxu0 %v1508_v3  ;;  %2147 = vmatprep.mubr.msk.f32.mxu1 %vm2242_vm0, %v2241_v8 }
 0x185   : > { %2155 = vmatprep.subr.mxu1 %v2241_v8  ;;  %2162 = vmatprep.mubr.msk.f32.mxu0 %vm2242_vm0, %v2241_v8 }
 0x186   : > { %2170 = vmatprep.subr.mxu0 %v2241_v8  ;;  %2148 = vmatmul.mubr.f32.vlgmr.msra.gmra.mrb[10].mxu1 %v2367_v41 }
 0x187   : > { %2156 = vmatpush3.msra.mxu1 %v1511_v20  ;;  %2163 = vmatmul.mubr.f32.vlgmr.msra.gmra.mrb[14].mxu0 %v2378_v55 }
 0x188   : > { %2171 = vmatpush3.msra.mxu0 %v1509_v13  ;;  %2157 = vmatprep.mubr.msk.f32.mxu1 %vm2242_vm0, %v2241_v8 }
 0x189   : > { %2165 = vmatprep.subr.mxu1 %v2241_v8  ;;  %2172 = vmatprep.mubr.msk.f32.mxu0 %vm2242_vm0, %v2241_v8 }
 0x18a   : > { %2158 = vmatmul.mubr.f32.vlgmr.msra.gmra.mrb[12].mxu1 %v2374_v47 }
 0x18b   : > { %2166 = vmatpush3.msra.mxu1 %v2380_v60  ;;  %2167 = vmatprep.mubr.msk.f32.mxu1 %vm2242_vm0, %v2241_v8 }
 0x18c   : > { %2175 = vmatprep.subr.mxu1 %v2241_v8  ;;  %2173 = vmatmul.mubr.f32.vlgmr.msra.gmra.mrb[16].mxu0 %v2374_v47 }
 0x18e   : > { %2168 = vmatmul.mubr.f32.vlgmr.msra.gmra.mrb[14].mxu1 %v1498_v62 }
 0x18f   : > { %2176 = vmatpush3.msra.mxu1 %v2380_v60  ;;  %2177 = vmatprep.mubr.msk.f32.mxu1 %vm2242_vm0, %v2241_v8 }
 0x192   : > { %2178 = vmatmul.mubr.f32.vlgmr.msra.gmra.mrb[16].mxu1 %v2374_v47 }
 0x249   : > { %v1048_v21 = vpop.f32.mrb[6].mxu0 }
 0x24a   : > { %v1049_v22 = vadd.f32 %v1048_v21, %v961_v17  ;;  %v2124_v23 = vpop.f32.mrb[7].mxu0 }
 0x24d   : > { %v1198_v24 = vpop.f32.mrb[8].mxu0 }
 0x24e   : > { %v2134_v25 = vpop.f32.mrb[9].mxu0 }
 0x251   : > { %v1124_v26 = vpop.f32.mrb[6].mxu1 }
 0x252   : > { %v1125_v27 = vadd.f32 %v1124_v26, %v1049_v22  ;;  %v2129_v28 = vpop.f32.mrb[7].mxu1  ;;  %v1346_v29 = vpop.f32.mrb[10].mxu0 }
 0x253   : > { %v2144_v30 = vpop.f32.mrb[11].mxu0 }
 0x254   : > { %v1199_v31 = vadd.f32 %v1198_v24, %v1125_v27 }
 0x255   : > { %v1272_v32 = vpop.f32.mrb[8].mxu1 }
 0x256   : > { %v1273_v33 = vadd.f32 %v1272_v32, %v1199_v31  ;;  %v2139_v34 = vpop.f32.mrb[9].mxu1  ;;  %v1502_v35 = vpop.f32.mrb[12].mxu0 }
 0x257   : > { %v2154_v36 = vpop.f32.mrb[13].mxu0 }
 0x258   : > { %v1347_v37 = vadd.f32 %v1346_v29, %v1273_v33 }
 0x259   : > { %v1418_v8 = vpop.f32.mrb[10].mxu1 }
 0x25a   : > { %v1419_v38 = vadd.f32 %v1418_v8, %v1347_v37  ;;  %v2149_v39 = vpop.f32.mrb[11].mxu1  ;;  %v1652_v40 = vpop.f32.mrb[14].mxu0 }
 0x25b   : > { %v2164_v41 = vpop.f32.mrb[15].mxu0 }
 0x25d   : > { %v1578_v42 = vpop.f32.mrb[12].mxu1 }
 0x25e   : > { %v1579_v43 = vadd.f32 %v1578_v42, %v1502_v35  ;;  %v2159_v44 = vpop.f32.mrb[13].mxu1 }
 0x25f   : > { %v1800_v45 = vpop.f32.mrb[16].mxu0 }
 0x260   : > { %v1653_v46 = vadd.f32 %v1652_v40, %v1579_v43  ;;  %v2174_v47 = vpop.f32.mrb[17].mxu0 }
 0x261   : > { %v1726_v48 = vpop.f32.mrb[14].mxu1 }
 0x262   : > { %v1727_v49 = vadd.f32 %v1726_v48, %v1653_v46  ;;  %v2169_v50 = vpop.f32.mrb[15].mxu1 }
 0x264   : > { %v1801_v51 = vadd.f32 %v1800_v45, %v1727_v49 }
 0x265   : > { %v1872_v52 = vpop.f32.mrb[16].mxu1 }
 0x266   : > { %v1873_v53 = vadd.f32 %v1872_v52, %v1801_v51  ;;  %v2179_v54 = vpop.f32.mrb[17].mxu1 }
 0x268   : > { %v1876_v55 = vadd.f32 %v1873_v53, %v1419_v38 }
 0x26a   : > { %v1883_v57 = vadd.f32 %v1881_v56, %v1876_v55 }
 0x26c   : > { %1884 = vst.msk [vmem:[%s441_s20] sm:$0xff] %vm465_vm2, %v1883_v57  ;;  %v1885_v58 = vsel %vm465_vm2, %v1883_v57, 0.0  ;;  %v1889_v59 = vmul.f32 %v1883_v57, %v1883_v57 }
 0x26d   : > { %1886 = vadd.xlane.f32.xlu0 %v1885_v58 }
 0x26e   : > { %v1890_v60 = vsel %vm465_vm2, %v1889_v59, 0.0 }
 0x26f   : > { %1891 = vadd.xlane.f32.xlu1 %v1890_v60 }
 0x2fa   : > { %v1887_v61 = vpop.xlane.xlu0 %1886 }
 0x2fb   : > { %1888 = vst.msk [vmem:[%s448_s23] sm:$0xff] %vm970_vm5, %v1887_v61 }
 0x2fc   : > { %v1892_v62 = vpop.xlane.xlu1 %1891 }
 0x2fd   : > { %1894 = vst.msk [vmem:[%s448_s23] sm:$0xff] %vm1893_vm6, %v1892_v62 }
 0x2fe PF: > { %s19_s29 = sadd.s32 1, %s2236_s29   ;;  %s2455_s27 = smov %s2232_s28 }
 0x2ff   : > { %p16_p5 = scmp.ge.s32.totalorder %s19_s29, 4   ;;  %s2456_s28 = smov %s2458_s30 }
 0x301   :  { %18 = sbr.rel (!%p16_p5) target bundleno = 2 (0x2), region = 98 }

</bundles_post_ra>
